<compile_context>
chip_gen: v7x
topology: tpu7x:2x2x1
jax: 0.10.0
libtpu: 0.0.40
codegen_flags: <defaults>
</compile_context>

<pallas_src>
import functools

import jax
import jax.numpy as jnp
from jax import lax
from jax.experimental import pallas as pl
from jax.experimental.pallas import tpu as pltpu


def _identity_block_kernel(H, W, x_ref, w1_ref, b1_ref, w2_ref, b2_ref,
                           w3_ref, b3_ref, o_ref, pad_ref, slab_ref):
    # x_ref: (1, Cin, H*W) f32 -- one batch element per grid step, channels on
    # sublanes, flattened spatial on lanes.
    HW = H * W
    C0 = w1_ref.shape[0]

    # --- conv1 (1x1) + folded BN1 + ReLU : one MXU matmul, f32 accumulation ---
    x_bf = x_ref[0].astype(jnp.bfloat16)                       # (Cin, HW) bf16
    y1 = jnp.dot(w1_ref[...], x_bf,
                 preferred_element_type=jnp.float32) + b1_ref[...]
    y1 = jnp.maximum(y1, 0.0)                                   # (C0, HW) f32

    # --- stage y1 into the zero-padded bf16 scratch ---
    # Interior is fully overwritten every step; only the 1-element spatial border
    # must be zero, so zero just the border (4 thin stores) each step.  (Re-zeroing
    # per step keeps the kernel correct when the parallel batch axis is sharded
    # across TensorCores -- each core owns its own scratch instance.)
    pad_ref[:, 0:1, :] = jnp.zeros((C0, 1, W + 2), jnp.bfloat16)
    pad_ref[:, H + 1:H + 2, :] = jnp.zeros((C0, 1, W + 2), jnp.bfloat16)
    pad_ref[:, :, 0:1] = jnp.zeros((C0, H + 2, 1), jnp.bfloat16)
    pad_ref[:, :, W + 1:W + 2] = jnp.zeros((C0, H + 2, 1), jnp.bfloat16)
    pad_ref[:, 1:H + 1, 1:W + 1] = y1.reshape(C0, H, W).astype(jnp.bfloat16)

    # --- conv2 (3x3, padding=1) + folded BN2 + ReLU via im2col ---
    # Fill the (9*C0, H, W) bf16 slab with the 9 shifted patches by direct stores
    # (no f32 concat), then do ONE big-K MXU matmul against (C1, 9*C0).
    for k in range(9):
        dy, dx = k // 3, k % 3
        slab_ref[k * C0:(k + 1) * C0, :, :] = pad_ref[:, dy:dy + H, dx:dx + W]
    slab = slab_ref[...].reshape(9 * C0, HW)                    # bf16, single reshape
    y2 = jnp.dot(w2_ref[...], slab,
                 preferred_element_type=jnp.float32) + b2_ref[...]
    y2 = jnp.maximum(y2, 0.0)                                   # (C1, HW) f32

    # --- conv3 (1x1) + folded BN3 ---
    y3 = jnp.dot(w3_ref[...], y2.astype(jnp.bfloat16),
                 preferred_element_type=jnp.float32) + b3_ref[...]

    # --- residual add (late re-read of the resident input block) + ReLU ---
    out = jnp.maximum(y3 + x_ref[0], 0.0)                       # (C2, HW) f32
    o_ref[0] = out.astype(o_ref.dtype)


def _fold_bn(w, b, gamma, beta, mean, var, eps=1e-5):
    """Fold eval-mode BatchNorm into a conv weight with Cout on axis 0."""
    scale = gamma / jnp.sqrt(var + eps)
    w_f = w * scale.reshape((-1,) + (1,) * (w.ndim - 1))
    b_f = (b - mean) * scale + beta
    return w_f, b_f


@jax.jit
def identity_block(x_nchw, params):
    x = x_nchw.astype(jnp.float32)
    N, Cin, H, W = x.shape
    HW = H * W
    # Free metadata reshape of contiguous NCHW -> (N, C, H*W): lane-dense blocks,
    # no transposes, no extra HBM traffic.
    x2 = x.reshape(N, Cin, HW)

    # PyTorch conv weight layouts: (Cout, Cin, kh, kw).  Kept with Cout on axis 0.
    w1 = params["conv1_w"][:, :, 0, 0]                 # (C0, Cin)
    w2 = params["conv2_w"]                              # (C1, C0, 3, 3)
    w3 = params["conv3_w"][:, :, 0, 0]                 # (C2, C1)

    # Fold BN in f32, then cast matmul operands to bf16 (MXU-native).
    w1f, b1f = _fold_bn(w1, params["conv1_b"], *params["bn1"])
    w2f, b2f = _fold_bn(w2, params["conv2_b"], *params["bn2"])
    w3f, b3f = _fold_bn(w3, params["conv3_b"], *params["bn3"])

    C0 = w1f.shape[0]
    C1 = w2f.shape[0]
    C2 = w3f.shape[0]
    assert C2 == Cin, "identity block requires out_channels[2] == in_channels"

    w1b = w1f.astype(jnp.bfloat16)                                       # (C0, Cin)
    # (C1, C0, 3, 3) -> (C1, 3, 3, C0) -> (C1, 9*C0); matches slab order (dy, dx, c0)
    w2b = jnp.transpose(w2f, (0, 2, 3, 1)).reshape(C1, 9 * C0).astype(jnp.bfloat16)
    w3b = w3f.astype(jnp.bfloat16)                                       # (C2, C1)
    b1r = b1f.reshape(C0, 1).astype(jnp.float32)
    b2r = b2f.reshape(C1, 1).astype(jnp.float32)
    b3r = b3f.reshape(C2, 1).astype(jnp.float32)

    kernel = functools.partial(_identity_block_kernel, H, W)

    out = pl.pallas_call(
        kernel,
        out_shape=jax.ShapeDtypeStruct((N, C2, HW), jnp.float32),
        grid_spec=pltpu.PrefetchScalarGridSpec(
            num_scalar_prefetch=0,
            grid=(N,),
            in_specs=[
                pl.BlockSpec((1, Cin, HW), lambda n: (n, 0, 0)),
                pl.BlockSpec((C0, Cin), lambda n: (0, 0)),
                pl.BlockSpec((C0, 1), lambda n: (0, 0)),
                pl.BlockSpec((C1, 9 * C0), lambda n: (0, 0)),
                pl.BlockSpec((C1, 1), lambda n: (0, 0)),
                pl.BlockSpec((C2, C1), lambda n: (0, 0)),
                pl.BlockSpec((C2, 1), lambda n: (0, 0)),
            ],
            out_specs=pl.BlockSpec((1, C2, HW), lambda n: (n, 0, 0)),
            scratch_shapes=[
                pltpu.VMEM((C0, H + 2, W + 2), jnp.bfloat16),   # padded y1 staging
                pltpu.VMEM((9 * C0, H, W), jnp.bfloat16),        # im2col slab
            ],
        ),
        compiler_params=pltpu.CompilerParams(
            dimension_semantics=("parallel",),      # batch axis -> dual TC on v7x
            vmem_limit_bytes=32 * 1024 * 1024,      # safe on v5e/v6e/v7x at this tiling
        ),
    )(x2, w1b, b1r, w2b, b2r, w3b, b3r)

    # Free metadata reshape back to NCHW.
    return out.reshape(N, C2, H, W)


# ---------- pure-JAX reference (eval-mode BN), NCHW like PyTorch ----------
def _reference(x, params, eps=1e-5):
    def conv(x, w, b, pad):
        y = lax.conv_general_dilated(x, w, window_strides=(1, 1),
                                     padding=[(pad, pad), (pad, pad)],
                                     dimension_numbers=("NCHW", "OIHW", "NCHW"))
        return y + b[None, :, None, None]

    def bn(x, p):
        g, b, m, v = p
        return (x - m[None, :, None, None]) / jnp.sqrt(v[None, :, None, None] + eps) \
               * g[None, :, None, None] + b[None, :, None, None]

    idn = x
    y = jax.nn.relu(bn(conv(x, params["conv1_w"], params["conv1_b"], 0), params["bn1"]))
    y = jax.nn.relu(bn(conv(y, params["conv2_w"], params["conv2_b"], 1), params["bn2"]))
    y = bn(conv(y, params["conv3_w"], params["conv3_b"], 0), params["bn3"])
    return jax.nn.relu(y + idn)


def _make_params(key, in_channels, out_channels):
    c0, c1, c2 = out_channels
    ks = jax.random.split(key, 12)
    p = {
        "conv1_w": jax.random.normal(ks[0], (c0, in_channels, 1, 1), jnp.float32) * 0.1,
        "conv1_b": jax.random.normal(ks[1], (c0,), jnp.float32) * 0.1,
        "conv2_w": jax.random.normal(ks[2], (c1, c0, 3, 3), jnp.float32) * 0.1,
        "conv2_b": jax.random.normal(ks[3], (c1,), jnp.float32) * 0.1,
        "conv3_w": jax.random.normal(ks[4], (c2, c1, 1, 1), jnp.float32) * 0.1,
        "conv3_b": jax.random.normal(ks[5], (c2,), jnp.float32) * 0.1,
        "bn1": (jnp.abs(jax.random.normal(ks[6], (c0,))) + 0.5,
                jax.random.normal(ks[7], (c0,)) * 0.1,
                jax.random.normal(ks[8], (c0,)) * 0.1,
                jnp.abs(jax.random.normal(ks[9], (c0,))) + 0.5),
        "bn2": (jnp.abs(jax.random.normal(ks[10], (c1,))) + 0.5,
                jax.random.normal(ks[11], (c1,)) * 0.1,
                jnp.zeros((c1,)),
                jnp.ones((c1,))),
        "bn3": (jnp.ones((c2,)),
                jnp.zeros((c2,)),
                jnp.zeros((c2,)),
                jnp.ones((c2,))),
    }
    return p


if __name__ == "__main__":
    key = jax.random.PRNGKey(0)
    k_x, k_p = jax.random.split(key)

    N, Cin, H, W = 2, 8, 16, 16
    out_channels = (4, 4, Cin)   # identity block: last == in_channels

    x = jax.random.normal(k_x, (N, Cin, H, W), jnp.float32)
    params = _make_params(k_p, Cin, out_channels)

    y = identity_block(x, params)
    y = jax.block_until_ready(y)

    y_ref = _reference(x, params)
    assert y.shape == x.shape, (y.shape, x.shape)
    # bf16 MXU operands (f32 accumulation) -> loosened tolerance vs f32 reference.
    assert jnp.allclose(y, y_ref, atol=5e-2, rtol=5e-2), \
        float(jnp.max(jnp.abs(y - y_ref)))

    print("KERNEL_OK")
</pallas_src>

<mosaic_0001>
module attributes {stable_mosaic.version = 11 : i64} {
  func.func @_identity_block_kernel(%arg0: i32, %arg1: memref<1x8x256xf32, #tpu.memory_space<vmem>>, %arg2: memref<4x8xbf16, #tpu.memory_space<vmem>>, %arg3: memref<4x1xf32, #tpu.memory_space<vmem>>, %arg4: memref<4x36xbf16, #tpu.memory_space<vmem>>, %arg5: memref<4x1xf32, #tpu.memory_space<vmem>>, %arg6: memref<8x4xbf16, #tpu.memory_space<vmem>>, %arg7: memref<8x1xf32, #tpu.memory_space<vmem>>, %arg8: memref<1x8x256xf32, #tpu.memory_space<vmem>>, %arg9: memref<4x18x18xbf16, #tpu.memory_space<vmem>>, %arg10: memref<36x16x16xbf16, #tpu.memory_space<vmem>>) attributes {dimension_semantics = [#tpu.dimension_semantics<parallel>], iteration_bounds = array<i64: 2>, scalar_prefetch = 0 : i64, scratch_operands = 2 : i64, tpu.core_type = #tpu.core_type<tc>, window_params = [{transform_indices = @transform_0, window_bounds = array<i64: 1, 8, 256>}, {pipeline_mode = #tpu.pipeline_mode<synchronous>, transform_indices = @transform_1, window_bounds = array<i64: 4, 8>}, {pipeline_mode = #tpu.pipeline_mode<synchronous>, transform_indices = @transform_2, window_bounds = array<i64: 4, 1>}, {pipeline_mode = #tpu.pipeline_mode<synchronous>, transform_indices = @transform_3, window_bounds = array<i64: 4, 36>}, {pipeline_mode = #tpu.pipeline_mode<synchronous>, transform_indices = @transform_4, window_bounds = array<i64: 4, 1>}, {pipeline_mode = #tpu.pipeline_mode<synchronous>, transform_indices = @transform_5, window_bounds = array<i64: 8, 4>}, {pipeline_mode = #tpu.pipeline_mode<synchronous>, transform_indices = @transform_6, window_bounds = array<i64: 8, 1>}, {transform_indices = @transform_7, window_bounds = array<i64: 1, 8, 256>}]} {
    %c0 = arith.constant 0 : index
    %c0_0 = arith.constant 0 : index
    %c0_1 = arith.constant 0 : index
    %0 = vector.load %arg1[%c0, %c0_0, %c0_1] : memref<1x8x256xf32, #tpu.memory_space<vmem>>, vector<1x8x256xf32>
    %1 = vector.shape_cast %0 : vector<1x8x256xf32> to vector<8x256xf32>
    %2 = arith.truncf %1 : vector<8x256xf32> to vector<8x256xbf16>
    %c0_2 = arith.constant 0 : index
    %c0_3 = arith.constant 0 : index
    %3 = vector.load %arg2[%c0_2, %c0_3] : memref<4x8xbf16, #tpu.memory_space<vmem>>, vector<4x8xbf16>
    %cst = arith.constant dense<0.000000e+00> : vector<4x256xf32>
    %4 = tpu.matmul %3, %2, %cst {dimension_numbers = #tpu.dot_dimension_numbers<[1], [0], [0], [1], [0, 0, 1, 1], [], []>} : vector<4x8xbf16>, vector<8x256xbf16>, vector<4x256xf32> -> vector<4x256xf32>
    %c0_4 = arith.constant 0 : index
    %c0_5 = arith.constant 0 : index
    %5 = vector.load %arg3[%c0_4, %c0_5] : memref<4x1xf32, #tpu.memory_space<vmem>>, vector<4x1xf32>
    %6 = vector.broadcast %5 : vector<4x1xf32> to vector<4x256xf32>
    %7 = arith.addf %4, %6 : vector<4x256xf32>
    %cst_6 = arith.constant 0.000000e+00 : f32
    %8 = vector.broadcast %cst_6 : f32 to vector<4x256xf32>
    %9 = arith.maximumf %7, %8 : vector<4x256xf32>
    %cst_7 = arith.constant 0.000000e+00 : bf16
    %10 = vector.broadcast %cst_7 : bf16 to vector<4x1x18xbf16>
    %c0_8 = arith.constant 0 : index
    %c0_9 = arith.constant 0 : index
    %c0_10 = arith.constant 0 : index
    %11 = vector.load %arg9[%c0_8, %c0_9, %c0_10] : memref<4x18x18xbf16, #tpu.memory_space<vmem>>, vector<4x1x18xbf16>
    tpu.vector_store %arg9[%c0_8, %c0_9, %c0_10], %10 {strides = array<i32>} : memref<4x18x18xbf16, #tpu.memory_space<vmem>>, vector<4x1x18xbf16>,
    %cst_11 = arith.constant 0.000000e+00 : bf16
    %12 = vector.broadcast %cst_11 : bf16 to vector<4x1x18xbf16>
    %c0_12 = arith.constant 0 : index
    %c17 = arith.constant 17 : index
    %c0_13 = arith.constant 0 : index
    %13 = vector.load %arg9[%c0_12, %c17, %c0_13] : memref<4x18x18xbf16, #tpu.memory_space<vmem>>, vector<4x1x18xbf16>
    tpu.vector_store %arg9[%c0_12, %c17, %c0_13], %12 {strides = array<i32>} : memref<4x18x18xbf16, #tpu.memory_space<vmem>>, vector<4x1x18xbf16>,
    %cst_14 = arith.constant 0.000000e+00 : bf16
    %14 = vector.broadcast %cst_14 : bf16 to vector<4x18x1xbf16>
    %c0_15 = arith.constant 0 : index
    %c0_16 = arith.constant 0 : index
    %c0_17 = arith.constant 0 : index
    %15 = vector.load %arg9[%c0_15, %c0_16, %c0_17] : memref<4x18x18xbf16, #tpu.memory_space<vmem>>, vector<4x18x1xbf16>
    tpu.vector_store %arg9[%c0_15, %c0_16, %c0_17], %14 {strides = array<i32>} : memref<4x18x18xbf16, #tpu.memory_space<vmem>>, vector<4x18x1xbf16>,
    %cst_18 = arith.constant 0.000000e+00 : bf16
    %16 = vector.broadcast %cst_18 : bf16 to vector<4x18x1xbf16>
    %c0_19 = arith.constant 0 : index
    %c0_20 = arith.constant 0 : index
    %c17_21 = arith.constant 17 : index
    %17 = vector.load %arg9[%c0_19, %c0_20, %c17_21] : memref<4x18x18xbf16, #tpu.memory_space<vmem>>, vector<4x18x1xbf16>
    tpu.vector_store %arg9[%c0_19, %c0_20, %c17_21], %16 {strides = array<i32>} : memref<4x18x18xbf16, #tpu.memory_space<vmem>>, vector<4x18x1xbf16>,
    %18 = vector.shape_cast %9 : vector<4x256xf32> to vector<4x16x16xf32>
    %19 = arith.truncf %18 : vector<4x16x16xf32> to vector<4x16x16xbf16>
    %c0_22 = arith.constant 0 : index
    %c1 = arith.constant 1 : index
    %c1_23 = arith.constant 1 : index
    %20 = vector.load %arg9[%c0_22, %c1, %c1_23] : memref<4x18x18xbf16, #tpu.memory_space<vmem>>, vector<4x16x16xbf16>
    tpu.vector_store %arg9[%c0_22, %c1, %c1_23], %19 {strides = array<i32>} : memref<4x18x18xbf16, #tpu.memory_space<vmem>>, vector<4x16x16xbf16>,
    %c0_24 = arith.constant 0 : index
    %c0_25 = arith.constant 0 : index
    %c0_26 = arith.constant 0 : index
    %21 = vector.load %arg9[%c0_24, %c0_25, %c0_26] : memref<4x18x18xbf16, #tpu.memory_space<vmem>>, vector<4x16x16xbf16>
    %c0_27 = arith.constant 0 : index
    %c0_28 = arith.constant 0 : index
    %c0_29 = arith.constant 0 : index
    %22 = vector.load %arg10[%c0_27, %c0_28, %c0_29] : memref<36x16x16xbf16, #tpu.memory_space<vmem>>, vector<4x16x16xbf16>
    tpu.vector_store %arg10[%c0_27, %c0_28, %c0_29], %21 {strides = array<i32>} : memref<36x16x16xbf16, #tpu.memory_space<vmem>>, vector<4x16x16xbf16>,
    %c0_30 = arith.constant 0 : index
    %c0_31 = arith.constant 0 : index
    %c1_32 = arith.constant 1 : index
    %23 = vector.load %arg9[%c0_30, %c0_31, %c1_32] : memref<4x18x18xbf16, #tpu.memory_space<vmem>>, vector<4x16x16xbf16>
    %c4 = arith.constant 4 : index
    %c0_33 = arith.constant 0 : index
    %c0_34 = arith.constant 0 : index
    %24 = vector.load %arg10[%c4, %c0_33, %c0_34] : memref<36x16x16xbf16, #tpu.memory_space<vmem>>, vector<4x16x16xbf16>
    tpu.vector_store %arg10[%c4, %c0_33, %c0_34], %23 {strides = array<i32>} : memref<36x16x16xbf16, #tpu.memory_space<vmem>>, vector<4x16x16xbf16>,
    %c0_35 = arith.constant 0 : index
    %c0_36 = arith.constant 0 : index
    %c2 = arith.constant 2 : index
    %25 = vector.load %arg9[%c0_35, %c0_36, %c2] : memref<4x18x18xbf16, #tpu.memory_space<vmem>>, vector<4x16x16xbf16>
    %c8 = arith.constant 8 : index
    %c0_37 = arith.constant 0 : index
    %c0_38 = arith.constant 0 : index
    %26 = vector.load %arg10[%c8, %c0_37, %c0_38] : memref<36x16x16xbf16, #tpu.memory_space<vmem>>, vector<4x16x16xbf16>
    tpu.vector_store %arg10[%c8, %c0_37, %c0_38], %25 {strides = array<i32>} : memref<36x16x16xbf16, #tpu.memory_space<vmem>>, vector<4x16x16xbf16>,
    %c0_39 = arith.constant 0 : index
    %c1_40 = arith.constant 1 : index
    %c0_41 = arith.constant 0 : index
    %27 = vector.load %arg9[%c0_39, %c1_40, %c0_41] : memref<4x18x18xbf16, #tpu.memory_space<vmem>>, vector<4x16x16xbf16>
    %c12 = arith.constant 12 : index
    %c0_42 = arith.constant 0 : index
    %c0_43 = arith.constant 0 : index
    %28 = vector.load %arg10[%c12, %c0_42, %c0_43] : memref<36x16x16xbf16, #tpu.memory_space<vmem>>, vector<4x16x16xbf16>
    tpu.vector_store %arg10[%c12, %c0_42, %c0_43], %27 {strides = array<i32>} : memref<36x16x16xbf16, #tpu.memory_space<vmem>>, vector<4x16x16xbf16>,
    %c0_44 = arith.constant 0 : index
    %c1_45 = arith.constant 1 : index
    %c1_46 = arith.constant 1 : index
    %29 = vector.load %arg9[%c0_44, %c1_45, %c1_46] : memref<4x18x18xbf16, #tpu.memory_space<vmem>>, vector<4x16x16xbf16>
    %c16 = arith.constant 16 : index
    %c0_47 = arith.constant 0 : index
    %c0_48 = arith.constant 0 : index
    %30 = vector.load %arg10[%c16, %c0_47, %c0_48] : memref<36x16x16xbf16, #tpu.memory_space<vmem>>, vector<4x16x16xbf16>
    tpu.vector_store %arg10[%c16, %c0_47, %c0_48], %29 {strides = array<i32>} : memref<36x16x16xbf16, #tpu.memory_space<vmem>>, vector<4x16x16xbf16>,
    %c0_49 = arith.constant 0 : index
    %c1_50 = arith.constant 1 : index
    %c2_51 = arith.constant 2 : index
    %31 = vector.load %arg9[%c0_49, %c1_50, %c2_51] : memref<4x18x18xbf16, #tpu.memory_space<vmem>>, vector<4x16x16xbf16>
    %c20 = arith.constant 20 : index
    %c0_52 = arith.constant 0 : index
    %c0_53 = arith.constant 0 : index
    %32 = vector.load %arg10[%c20, %c0_52, %c0_53] : memref<36x16x16xbf16, #tpu.memory_space<vmem>>, vector<4x16x16xbf16>
    tpu.vector_store %arg10[%c20, %c0_52, %c0_53], %31 {strides = array<i32>} : memref<36x16x16xbf16, #tpu.memory_space<vmem>>, vector<4x16x16xbf16>,
    %c0_54 = arith.constant 0 : index
    %c2_55 = arith.constant 2 : index
    %c0_56 = arith.constant 0 : index
    %33 = vector.load %arg9[%c0_54, %c2_55, %c0_56] : memref<4x18x18xbf16, #tpu.memory_space<vmem>>, vector<4x16x16xbf16>
    %c24 = arith.constant 24 : index
    %c0_57 = arith.constant 0 : index
    %c0_58 = arith.constant 0 : index
    %34 = vector.load %arg10[%c24, %c0_57, %c0_58] : memref<36x16x16xbf16, #tpu.memory_space<vmem>>, vector<4x16x16xbf16>
    tpu.vector_store %arg10[%c24, %c0_57, %c0_58], %33 {strides = array<i32>} : memref<36x16x16xbf16, #tpu.memory_space<vmem>>, vector<4x16x16xbf16>,
    %c0_59 = arith.constant 0 : index
    %c2_60 = arith.constant 2 : index
    %c1_61 = arith.constant 1 : index
    %35 = vector.load %arg9[%c0_59, %c2_60, %c1_61] : memref<4x18x18xbf16, #tpu.memory_space<vmem>>, vector<4x16x16xbf16>
    %c28 = arith.constant 28 : index
    %c0_62 = arith.constant 0 : index
    %c0_63 = arith.constant 0 : index
    %36 = vector.load %arg10[%c28, %c0_62, %c0_63] : memref<36x16x16xbf16, #tpu.memory_space<vmem>>, vector<4x16x16xbf16>
    tpu.vector_store %arg10[%c28, %c0_62, %c0_63], %35 {strides = array<i32>} : memref<36x16x16xbf16, #tpu.memory_space<vmem>>, vector<4x16x16xbf16>,
    %c0_64 = arith.constant 0 : index
    %c2_65 = arith.constant 2 : index
    %c2_66 = arith.constant 2 : index
    %37 = vector.load %arg9[%c0_64, %c2_65, %c2_66] : memref<4x18x18xbf16, #tpu.memory_space<vmem>>, vector<4x16x16xbf16>
    %c32 = arith.constant 32 : index
    %c0_67 = arith.constant 0 : index
    %c0_68 = arith.constant 0 : index
    %38 = vector.load %arg10[%c32, %c0_67, %c0_68] : memref<36x16x16xbf16, #tpu.memory_space<vmem>>, vector<4x16x16xbf16>
    tpu.vector_store %arg10[%c32, %c0_67, %c0_68], %37 {strides = array<i32>} : memref<36x16x16xbf16, #tpu.memory_space<vmem>>, vector<4x16x16xbf16>,
    %c0_69 = arith.constant 0 : index
    %c0_70 = arith.constant 0 : index
    %c0_71 = arith.constant 0 : index
    %39 = vector.load %arg10[%c0_69, %c0_70, %c0_71] : memref<36x16x16xbf16, #tpu.memory_space<vmem>>, vector<36x16x16xbf16>
    %40 = vector.shape_cast %39 : vector<36x16x16xbf16> to vector<36x256xbf16>
    %c0_72 = arith.constant 0 : index
    %c0_73 = arith.constant 0 : index
    %41 = vector.load %arg4[%c0_72, %c0_73] : memref<4x36xbf16, #tpu.memory_space<vmem>>, vector<4x36xbf16>
    %cst_74 = arith.constant dense<0.000000e+00> : vector<4x256xf32>
    %42 = tpu.matmul %41, %40, %cst_74 {dimension_numbers = #tpu.dot_dimension_numbers<[1], [0], [0], [1], [0, 0, 1, 1], [], []>} : vector<4x36xbf16>, vector<36x256xbf16>, vector<4x256xf32> -> vector<4x256xf32>
    %c0_75 = arith.constant 0 : index
    %c0_76 = arith.constant 0 : index
    %43 = vector.load %arg5[%c0_75, %c0_76] : memref<4x1xf32, #tpu.memory_space<vmem>>, vector<4x1xf32>
    %44 = vector.broadcast %43 : vector<4x1xf32> to vector<4x256xf32>
    %45 = arith.addf %42, %44 : vector<4x256xf32>
    %cst_77 = arith.constant 0.000000e+00 : f32
    %46 = vector.broadcast %cst_77 : f32 to vector<4x256xf32>
    %47 = arith.maximumf %45, %46 : vector<4x256xf32>
    %c0_78 = arith.constant 0 : index
    %c0_79 = arith.constant 0 : index
    %48 = vector.load %arg6[%c0_78, %c0_79] : memref<8x4xbf16, #tpu.memory_space<vmem>>, vector<8x4xbf16>
    %49 = arith.truncf %47 : vector<4x256xf32> to vector<4x256xbf16>
    %cst_80 = arith.constant dense<0.000000e+00> : vector<8x256xf32>
    %50 = tpu.matmul %48, %49, %cst_80 {dimension_numbers = #tpu.dot_dimension_numbers<[1], [0], [0], [1], [0, 0, 1, 1], [], []>} : vector<8x4xbf16>, vector<4x256xbf16>, vector<8x256xf32> -> vector<8x256xf32>
    %c0_81 = arith.constant 0 : index
    %c0_82 = arith.constant 0 : index
    %51 = vector.load %arg7[%c0_81, %c0_82] : memref<8x1xf32, #tpu.memory_space<vmem>>, vector<8x1xf32>
    %52 = vector.broadcast %51 : vector<8x1xf32> to vector<8x256xf32>
    %53 = arith.addf %50, %52 : vector<8x256xf32>
    %c0_83 = arith.constant 0 : index
    %c0_84 = arith.constant 0 : index
    %c0_85 = arith.constant 0 : index
    %54 = vector.load %arg1[%c0_83, %c0_84, %c0_85] : memref<1x8x256xf32, #tpu.memory_space<vmem>>, vector<1x8x256xf32>
    %55 = vector.shape_cast %54 : vector<1x8x256xf32> to vector<8x256xf32>
    %56 = arith.addf %53, %55 : vector<8x256xf32>
    %cst_86 = arith.constant 0.000000e+00 : f32
    %57 = vector.broadcast %cst_86 : f32 to vector<8x256xf32>
    %58 = arith.maximumf %56, %57 : vector<8x256xf32>
    %c0_87 = arith.constant 0 : index
    %c0_88 = arith.constant 0 : index
    %c0_89 = arith.constant 0 : index
    %59 = vector.load %arg8[%c0_87, %c0_88, %c0_89] : memref<1x8x256xf32, #tpu.memory_space<vmem>>, vector<1x8x256xf32>
    %60 = vector.shape_cast %59 : vector<1x8x256xf32> to vector<8x256xf32>
    %61 = vector.shape_cast %58 : vector<8x256xf32> to vector<1x8x256xf32>
    tpu.vector_store %arg8[%c0_87, %c0_88, %c0_89], %61 {strides = array<i32>} : memref<1x8x256xf32, #tpu.memory_space<vmem>>, vector<1x8x256xf32>,
    return
  }
  func.func @transform_0(%arg0: i32) -> (i32, i32, i32) {
    %c0_i32 = arith.constant 0 : i32
    %c0_i32_0 = arith.constant 0 : i32
    %c0_i32_1 = arith.constant 0 : i32
    return %arg0, %c0_i32, %c0_i32_0 : i32, i32, i32
  }
  func.func @transform_1(%arg0: i32) -> (i32, i32) {
    %c0_i32 = arith.constant 0 : i32
    %c0_i32_0 = arith.constant 0 : i32
    %c0_i32_1 = arith.constant 0 : i32
    return %c0_i32, %c0_i32_0 : i32, i32
  }
  func.func @transform_2(%arg0: i32) -> (i32, i32) {
    %c0_i32 = arith.constant 0 : i32
    %c0_i32_0 = arith.constant 0 : i32
    %c0_i32_1 = arith.constant 0 : i32
    return %c0_i32, %c0_i32_0 : i32, i32
  }
  func.func @transform_3(%arg0: i32) -> (i32, i32) {
    %c0_i32 = arith.constant 0 : i32
    %c0_i32_0 = arith.constant 0 : i32
    %c0_i32_1 = arith.constant 0 : i32
    return %c0_i32, %c0_i32_0 : i32, i32
  }
  func.func @transform_4(%arg0: i32) -> (i32, i32) {
    %c0_i32 = arith.constant 0 : i32
    %c0_i32_0 = arith.constant 0 : i32
    %c0_i32_1 = arith.constant 0 : i32
    return %c0_i32, %c0_i32_0 : i32, i32
  }
  func.func @transform_5(%arg0: i32) -> (i32, i32) {
    %c0_i32 = arith.constant 0 : i32
    %c0_i32_0 = arith.constant 0 : i32
    %c0_i32_1 = arith.constant 0 : i32
    return %c0_i32, %c0_i32_0 : i32, i32
  }
  func.func @transform_6(%arg0: i32) -> (i32, i32) {
    %c0_i32 = arith.constant 0 : i32
    %c0_i32_0 = arith.constant 0 : i32
    %c0_i32_1 = arith.constant 0 : i32
    return %c0_i32, %c0_i32_0 : i32, i32
  }
  func.func @transform_7(%arg0: i32) -> (i32, i32, i32) {
    %c0_i32 = arith.constant 0 : i32
    %c0_i32_0 = arith.constant 0 : i32
    %c0_i32_1 = arith.constant 0 : i32
    return %arg0, %c0_i32, %c0_i32_0 : i32, i32, i32
  }
}

</mosaic_0001>

<bundles_post_ra>
// kernel: identity_block.1
= control target key start
LH: loop header
LB: loop body
LE: loop exit
PB: predicated region body
PF: predicated region fallthrough
CT: control target
= control target key end

     0   :  { %s2901_s24 = smov 0   ;;  %s3760_s0 = inlined_call_operand.vmem [shape: f32[2,8,256], index: 0, kind: input, shape index: {}]   ;;  %s3761_s1 = inlined_call_operand.vmem [shape: bf16[4,8], index: 1, kind: input, shape index: {}]   ;;  %s3762_s2 = inlined_call_operand.vmem [shape: f32[4,1], index: 2, kind: input, shape index: {}]   ;;  %s3763_s3 = inlined_call_operand.vmem [shape: bf16[4,36], index: 3, kind: input, shape index: {}]   ;;  %s3764_s4 = inlined_call_operand.vmem [shape: f32[4,1], index: 4, kind: input, shape index: {}]   ;;  %s3765_s5 = inlined_call_operand.vmem [shape: bf16[8,4], index: 5, kind: input, shape index: {}]   ;;  %s3766_s6 = inlined_call_operand.vmem [shape: f32[8,1], index: 6, kind: input, shape index: {}]   ;;  %s3767_s7 = inlined_call_operand.vmem [shape: f32[2,8,256], index: 7, kind: output, shape index: {}]  }
   0x1 LB: > { %s2674_s25 = sadd.s32 4294967295, %s2846_s24   ;;  %p2678_p0 = scmp.ge.s32.totalorder %s2846_s24, 1  ;;  %s2846_s24 = sphi %s2901_s24, %s17_s24  }
   0x2   : > { %p237_p1 = scmp.lt.s32.totalorder %s2846_s24, 3 }
   0x4   : > { %p238_p2 = pnand %p2678_p0, %p237_p1 }
   0x6   : > { %241 = sbr.rel (%p238_p2) target bundleno = 1348 (0x544), region = 48 }
   0xd   : > { %p269_p3 = scmp.lt.s32.totalorder %s2674_s25, 1  ;;  %v3768_v0 = vmov 0   ;;  %v285_v1 = vld [vmem:[%s3762_s2] sm:$0xf]  ;;  %vm295_vm0 = vcmask 1043456   ;;  %vm291_vm1 = vcmask 64512   ;;  %v450_v32 = vlaneseq }
   0xe   : > { %334 = vmatprep.mubr.bf16.mxu0 %v3768_v0  ;;  %2790 = vset.pattern.permute.xlu0 %v3768_v0  ;;  %v284_v7 = vld [vmem:[%s3761_s1] sm:$0x3]  ;;  %s2849_s11 = smov 96   ;;  %s2850_s12 = smov 112   ;;  %vm346_vm2 = vsmask.f32 256 }
   0xf   : > { %s3804_s25 = smov (!%p269_p3, %s2674_s25), 1  ;;  %288 = vperm.xlu0 %2790, %v285_v1   ;;  %2540 = vmatprep.mubr.bf16.mxu1 %v3768_v0  ;;  %s2851_s13 = smov 80   ;;  %vm345_vm3 = vcmask 139264   ;;  %v348_v17 = vld [vmem:[#allocation2] sm:$0x1]  ;;  %vm374_vm5 = vcmask 3072  }
  0x10   : > { %2791 = vset.pattern.permute.xlu1 %v3768_v0  ;;  %s2759_s28 = sshll.u32 %s3804_s25, 4  ;;  %s2852_s14 = smov 64   ;;  %vm360_vm4 = vsmask.f32 7938  ;;  %vm2965_vm6 = vmand %vm345_vm3, %vm346_vm2  ;;  %v362_v19 = vld [vmem:[#allocation2 + $0x8] sm:$0x1] }
  0x11   : > { %s2924_s8 = scalar_lea.vmem %s3760_s0, %s2759_s28  ;;  %s2853_s15 = smov 48   ;;  %v365_v20 = vld [vmem:[#allocation2 + $0x14] sm:$0x1]  ;;  %vm388_vm7 = vcmask 142472   ;;  %376 = vst.msk [vmem:[#allocation2 + $0x4] sm:$0xf] %vm374_vm5, %v3768_v0  ;;  %vm361_vm8 = vmand %vm345_vm3, %vm360_vm4 }
  0x12   : > { %v281_v2 = vld [vmem:[%s2924_s8 + $0x8] sm:$0xff]  ;;  %v280_v3 = vld [vmem:[%s2924_s8] sm:$0xff]  ;;  %s2854_s16 = smov 32   ;;  %s2855_s17 = smov 16   ;;  %380 = vst.msk [vmem:[#allocation2 + $0x10] sm:$0xf] %vm374_vm5, %v3768_v0 }
  0x13   : > { %v283_v4 = vpack.c.bf16 %v281_v2, %v281_v2  ;;  %v282_v5 = vpack.c.bf16 %v280_v3, %v280_v3  ;;  %383 = vst.msk [vmem:[#allocation2 + $0x1c] sm:$0xf] %vm374_vm5, %v3768_v0  ;;  %386 = vst.msk [vmem:[#allocation2 + $0x28] sm:$0xf] %vm374_vm5, %v3768_v0  ;;  %v349_v21 = vsel %vm2965_vm6, 0, %v348_v17  ;;  %v363_v24 = vsel %vm361_vm8, 0, %v362_v19 }
  0x14   : > { %v368_v22 = vld [vmem:[#allocation2 + $0x20] sm:$0x1]  ;;  %v371_v23 = vld [vmem:[#allocation2 + $0x2c] sm:$0x1]  ;;  %390 = vst.msk [vmem:[#allocation2 + $0x4] sm:$0xf] %vm388_vm7, %v3768_v0 }
  0x15   : > { %2683 = vmatprep.subr.msk.bf16.mxu0 %vm295_vm0, %v283_v4  ;;  %v297_v6 = vsel %vm295_vm0, %v282_v5, 0  ;;  %394 = vst.msk [vmem:[#allocation2 + $0x10] sm:$0xf] %vm388_vm7, %v3768_v0  ;;  %397 = vst.msk [vmem:[#allocation2 + $0x1c] sm:$0xf] %vm388_vm7, %v3768_v0  ;;  %v366_v25 = vsel %vm361_vm8, 0, %v365_v20 }
  0x16   : > { %303 = vmatpush1.bf16.msra.mxu0 %v297_v6  ;;  %400 = vst.msk [vmem:[#allocation2 + $0x28] sm:$0xf] %vm388_vm7, %v3768_v0  ;;  %350 = vst [vmem:[#allocation2] sm:$0x1] %v349_v21  ;;  %v369_v26 = vsel %vm361_vm8, 0, %v368_v22  ;;  %v372_v27 = vsel %vm361_vm8, 0, %v371_v23 }
  0x17   : > { %364 = vst [vmem:[#allocation2 + $0x8] sm:$0x1] %v363_v24  ;;  %367 = vst [vmem:[#allocation2 + $0x14] sm:$0x1] %v366_v25  ;;  %v2856_v30 = vmov 1983009808  }
  0x18   : > { %370 = vst [vmem:[#allocation2 + $0x20] sm:$0x1] %v369_v26  ;;  %373 = vst [vmem:[#allocation2 + $0x2c] sm:$0x1] %v372_v27  ;;  %v448_v31 = vunpack.c.l.s4 %v2856_v30  ;;  %v451_v36 = vshrl.u32 %v450_v32, 7  ;;  %vm377_vm9 = vcmask 0  }
  0x19   : > { %2684 = vmatmul.mubr.msk.bf16.vlgmr.msra.gmra.mrb[0].mxu0 %vm291_vm1, %v284_v7  ;;  %375 = vst.msk [vmem:[#allocation2] sm:$0xf] %vm374_vm5, %v3768_v0  ;;  %v2857_v37 = vmov 1934713408   ;;  %v351_v44 = vld [vmem:[#allocation2 + $0xc] sm:$0x1] }
  0x1a   : > { %2602 = vmatprep.mubr.bf16.mxu0 %v3768_v0  ;;  %389 = vst.msk [vmem:[#allocation2] sm:$0xf] %vm388_vm7, %v3768_v0  ;;  %v449_v35 = vunpack.c.0.s8 %v448_v31  ;;  %v481_v38 = vunpack.c.l.s4 %v2857_v37  ;;  %v352_v45 = vsel %vm2965_vm6, 0, %v351_v44  ;;  %v354_v53 = vld [vmem:[#allocation2 + $0x18] sm:$0x1]  ;;  %vm391_vm10 = vcmask 139400  }
  0x1b   : > { %353 = vst [vmem:[#allocation2 + $0xc] sm:$0x1] %v352_v45  ;;  %v357_v54 = vld [vmem:[#allocation2 + $0x24] sm:$0x1]  ;;  %v355_v55 = vsel %vm2965_vm6, 0, %v354_v53  ;;  %s2858_s18 = smov 1  }
  0x1c   : > { %v2992_v42 = vsub.s32 %v449_v35, %v451_v36  ;;  %v482_v46 = vunpack.c.0.s8 %v481_v38  ;;  %379 = vst.msk [vmem:[#allocation2 + $0xc] sm:$0xf] %vm374_vm5, %v3768_v0  ;;  %v358_v56 = vsel %vm2965_vm6, 0, %v357_v54  ;;  %356 = vst [vmem:[#allocation2 + $0x18] sm:$0x1] %v355_v55  ;;  %vm712_vm13 = vcmask 134152  }
  0x1d   : > { %393 = vst.msk [vmem:[#allocation2 + $0xc] sm:$0xf] %vm388_vm7, %v3768_v0  ;;  %359 = vst [vmem:[#allocation2 + $0x24] sm:$0x1] %v358_v56  ;;  %vm606_vm11 = vsmask.f32 4368 }
  0x1e   : > { %v3007_v57 = vsub.s32 %v482_v46, %v451_v36  ;;  %382 = vst.msk [vmem:[#allocation2 + $0x18] sm:$0xf] %vm374_vm5, %v3768_v0  ;;  %385 = vst.msk [vmem:[#allocation2 + $0x24] sm:$0xf] %vm374_vm5, %v3768_v0  ;;  %vm719_vm15 = vcmask 131080   ;;  %vm777_vm1 = vcmask 130048  }
  0x1f   : > { %396 = vst.msk [vmem:[#allocation2 + $0x18] sm:$0xf] %vm388_vm7, %v3768_v0  ;;  %399 = vst.msk [vmem:[#allocation2 + $0x24] sm:$0xf] %vm388_vm7, %v3768_v0  ;;  %vm916_vm3 = vsmask.f32 7424 }
  0x20   : > { %378 = vst.msk [vmem:[#allocation2 + $0x8] sm:$0x1] %vm377_vm9, %v3768_v0  ;;  %381 = vst.msk [vmem:[#allocation2 + $0x14] sm:$0x1] %vm377_vm9, %v3768_v0  ;;  %s2859_s19 = smov 127   ;;  %s2860_s20 = smov 126  }
  0x21   : > { %384 = vst.msk [vmem:[#allocation2 + $0x20] sm:$0x1] %vm377_vm9, %v3768_v0  ;;  %387 = vst.msk [vmem:[#allocation2 + $0x2c] sm:$0x1] %vm377_vm9, %v3768_v0  ;;  %vm2408_vm5 = vcmask 392192   ;;  %vm2415_vm6 = vcmask 523264  }
  0x22   : > { %392 = vst.msk [vmem:[#allocation2 + $0x8] sm:$0x1] %vm391_vm10, %v3768_v0  ;;  %395 = vst.msk [vmem:[#allocation2 + $0x14] sm:$0x1] %vm391_vm10, %v3768_v0  ;;  %vm2422_vm7 = vcmask 654336   ;;  %vm2429_vm8 = vcmask 785408  }
  0x23   : > { %398 = vst.msk [vmem:[#allocation2 + $0x20] sm:$0x1] %vm391_vm10, %v3768_v0  ;;  %401 = vst.msk [vmem:[#allocation2 + $0x2c] sm:$0x1] %vm391_vm10, %v3768_v0  ;;  %vm2436_vm9 = vcmask 916480   ;;  %vm2503_vm10 = vcmask 1041408  }
  0x24   : > { %vm607_vm12 = vmor %vm346_vm2, %vm606_vm11  ;;  %vm2499_vm11 = vcmask 293888  }
  0x25   : > { %vm3059_vm14 = vmand %vm712_vm13, %vm360_vm4  ;;  %vm2401_vm4 = vcmask 261120  }
  0x26   : > { %vm3072_vm0 = vmand %vm719_vm15, %vm346_vm2  ;;  %vm1236_vm2 = vcmask 1046528  }
  0x8e   : > { %v289_v8 = vpop.permute.xlu0 %288 }
  0xec   : > { %v336_v9 = vpop.f32.mrb[0].mxu0 }
  0xed   : > { %v337_v10 = vadd.f32 %v336_v9, %v289_v8  ;;  %v338_v11 = vpop.f32.mrb[1].mxu0 }
  0xee   : > { %v340_v12 = vpop.f32.mrb[2].mxu0  ;;  %v339_v15 = vadd.f32 %v338_v11, %v289_v8 }
  0xef   : > { %v2932_v13 = vmax.f32 %v337_v10, 0.0  ;;  %v341_v14 = vpop.f32.mrb[3].mxu0 }
  0xf0   : > { %v2946_v16 = vmax.f32 %v339_v15, 0.0 }
  0xf1   : > { %406 = vrot.lane.b32.xlu1 %v2932_v13, %s2849_s11  ;;  %403 = vrot.lane.b32.xlu0 %v2932_v13, %s2850_s12 }
  0xf5   : > { %409 = vrot.lane.b32.xlu1 %v2932_v13, %s2851_s13  ;;  %412 = vrot.lane.b32.xlu0 %v2932_v13, %s2852_s14 }
  0xf9   : > { %415 = vrot.lane.b32.xlu1 %v2932_v13, %s2853_s15  ;;  %418 = vrot.lane.b32.xlu0 %v2932_v13, %s2854_s16 }
  0xfd   : > { %421 = vrot.lane.b32.xlu1 %v2932_v13, %s2855_s17  ;;  %425 = vrot.lane.b32.xlu0 %v2946_v16, %s2850_s12 }
 0x101   : > { %428 = vrot.lane.b32.xlu1 %v2946_v16, %s2849_s11  ;;  %431 = vrot.lane.b32.xlu0 %v2946_v16, %s2851_s13 }
 0x105   : > { %434 = vrot.lane.b32.xlu1 %v2946_v16, %s2852_s14  ;;  %437 = vrot.lane.b32.xlu0 %v2946_v16, %s2853_s15 }
 0x109   : > { %440 = vrot.lane.b32.xlu1 %v2946_v16, %s2854_s16  ;;  %443 = vrot.lane.b32.xlu0 %v2946_v16, %s2855_s17 }
 0x163   : > { %v407_v28 = vpop.permute.xlu1 %406  ;;  %v404_v29 = vpop.permute.xlu0 %403 }
 0x164   : > { %v446_v43 = vcombine.low %v2932_v13, %v407_v28 }
 0x166   : > { %v453_v51 = vrot.slane %v446_v43, %v2992_v42 }
 0x167   : > { %v410_v33 = vpop.permute.xlu1 %409  ;;  %v413_v34 = vpop.permute.xlu0 %412 }
 0x168   : > { %v454_v39 = vcombine.low %v404_v29, %v410_v33 }
 0x16a   : > { %v461_v47 = vrot.slane %v454_v39, %v2992_v42 }
 0x16b   : > { %v416_v40 = vpop.permute.xlu1 %415  ;;  %v419_v41 = vpop.permute.xlu0 %418 }
 0x16c   : > { %v462_v48 = vcombine.low %v413_v34, %v419_v41  ;;  %v478_v58 = vcombine.low %v453_v51, %v461_v47  ;;  %v479_v61 = vcombine.high %v453_v51, %v461_v47 }
 0x16e   : > { %v469_v59 = vrot.slane %v462_v48, %v2992_v42  ;;  %v486_v5 = vrot.slane %v478_v58, %v3007_v57  ;;  %v493_v8 = vrot.slane %v479_v61, %v3007_v57 }
 0x16f   : > { %v422_v49 = vpop.permute.xlu1 %421  ;;  %v426_v50 = vpop.permute.xlu0 %425 }
 0x170   : > { %v470_v52 = vcombine.low %v416_v40, %v422_v49 }
 0x172   : > { %v477_v60 = vrot.slane %v470_v52, %v2992_v42 }
 0x173   : > { %v429_v62 = vpop.permute.xlu1 %428  ;;  %v432_v63 = vpop.permute.xlu0 %431 }
 0x174   : > { %v494_v1 = vcombine.low %v469_v59, %v477_v60  ;;  %v495_v2 = vcombine.high %v469_v59, %v477_v60  ;;  %v514_v3 = vcombine.low %v2946_v16, %v429_v62  ;;  %v522_v4 = vcombine.low %v426_v50, %v432_v63 }
 0x176   : > { %v502_v6 = vrot.slane %v494_v1, %v3007_v57  ;;  %v509_v7 = vrot.slane %v495_v2, %v3007_v57  ;;  %v521_v11 = vrot.slane %v514_v3, %v2992_v42  ;;  %v529_v12 = vrot.slane %v522_v4, %v2992_v42 }
 0x177   : > { %v435_v9 = vpop.permute.xlu1 %434  ;;  %v438_v10 = vpop.permute.xlu0 %437 }
 0x178   : > { %v511_v13 = vcombine.high %v486_v5, %v502_v6  ;;  %v510_v14 = vcombine.low %v486_v5, %v502_v6  ;;  %v513_v15 = vcombine.high %v493_v8, %v509_v7  ;;  %v512_v16 = vcombine.low %v493_v8, %v509_v7 }
 0x179   : > { %v546_v23 = vcombine.low %v521_v11, %v529_v12  ;;  %v547_v27 = vcombine.high %v521_v11, %v529_v12 }
 0x17a   : > { %v2763_v17 = vpack.c.bf16 %v511_v13, %v511_v13  ;;  %v2761_v18 = vpack.c.bf16 %v510_v14, %v510_v14  ;;  %v2767_v21 = vpack.c.bf16 %v513_v15, %v513_v15  ;;  %v2765_v22 = vpack.c.bf16 %v512_v16, %v512_v16 }
 0x17b   : > { %v441_v19 = vpop.permute.xlu1 %440  ;;  %v444_v20 = vpop.permute.xlu0 %443  ;;  %v554_v45 = vrot.slane %v546_v23, %v3007_v57  ;;  %v561_v46 = vrot.slane %v547_v27, %v3007_v57  ;;  %v724_v27 = vld [vmem:[#allocation2 + $0xc] sm:$0xf] }
 0x17c   : > { %v530_v24 = vcombine.low %v435_v9, %v441_v19  ;;  %v538_v25 = vcombine.low %v438_v10, %v444_v20  ;;  %v626_v26 = vshrl.u32 %v2763_v17, 16  ;;  %v629_v28 = vshll.u32 %v2763_v17, 16 }
 0x17d   : > { %v609_v29 = vshrl.u32 %v2761_v18, 16  ;;  %v660_v30 = vshrl.u32 %v2767_v21, 16  ;;  %v643_v34 = vshrl.u32 %v2765_v22, 16  ;;  %v612_v36 = vshll.u32 %v2761_v18, 16 }
 0x17e   : > { %v537_v31 = vrot.slane %v530_v24, %v2992_v42  ;;  %v545_v32 = vrot.slane %v538_v25, %v2992_v42  ;;  %v628_v33 = vrot.slane %v626_v26, 7  ;;  %v663_v43 = vshll.u32 %v2767_v21, 16 }
 0x17f   : > { %v611_v35 = vrot.slane %v609_v29, 7  ;;  %v662_v37 = vrot.slane %v660_v30, 7  ;;  %v645_v44 = vrot.slane %v643_v34, 7  ;;  %v646_v50 = vshll.u32 %v2765_v22, 16  ;;  %v731_v34 = vld [vmem:[#allocation2 + $0x18] sm:$0xf] }
 0x180   : > { %v562_v38 = vcombine.low %v537_v31, %v545_v32  ;;  %v563_v39 = vcombine.high %v537_v31, %v545_v32  ;;  %v631_v40 = vor.u32 %v629_v28, %v628_v33  ;;  %v632_v12 = vrot.slane %v628_v33, 4  ;;  %v714_v28 = vld [vmem:[#allocation2] sm:$0xf]  ;;  %v738_v33 = vld [vmem:[#allocation2 + $0x24] sm:$0xf] }
 0x181   : > { %v614_v41 = vor.u32 %v612_v36, %v611_v35  ;;  %v665_v49 = vor.u32 %v663_v43, %v662_v37  ;;  %v648_v55 = vor.u32 %v646_v50, %v645_v44  ;;  %v615_v13 = vrot.slane %v611_v35, 4 }
 0x182   : > { %v570_v47 = vrot.slane %v562_v38, %v3007_v57  ;;  %v577_v48 = vrot.slane %v563_v39, %v3007_v57  ;;  %682 = vrot.lane.b32.xlu0 %v631_v40, %s2858_s18  ;;  %v666_v20 = vrot.slane %v662_v37, 4  ;;  %v649_v21 = vrot.slane %v645_v44, 4  ;;  %v721_v40 = vld [vmem:[#allocation2 + $0x8] sm:$0x1] }
 0x183   : > { %676 = vrot.lane.b32.xlu1 %v614_v41, %s2858_s18  ;;  %v728_v41 = vld [vmem:[#allocation2 + $0x14] sm:$0x1] }
 0x184   : > { %v578_v51 = vcombine.low %v554_v45, %v570_v47  ;;  %v579_v52 = vcombine.high %v554_v45, %v570_v47  ;;  %v580_v53 = vcombine.low %v561_v46, %v577_v48  ;;  %v581_v54 = vcombine.high %v561_v46, %v577_v48 }
 0x186   : > { %v2766_v56 = vpack.c.bf16 %v580_v53, %v580_v53  ;;  %v2768_v58 = vpack.c.bf16 %v581_v54, %v581_v54  ;;  %694 = vrot.lane.b32.xlu0 %v665_v49, %s2858_s18  ;;  %v2764_v59 = vpack.c.bf16 %v579_v52, %v579_v52  ;;  %v2762_v60 = vpack.c.bf16 %v578_v51, %v578_v51  ;;  %v735_v51 = vld [vmem:[#allocation2 + $0x20] sm:$0x1]  ;;  %v742_v52 = vld [vmem:[#allocation2 + $0x2c] sm:$0x1] }
 0x187   : > { %688 = vrot.lane.b32.xlu1 %v648_v55, %s2858_s18 }
 0x188   : > { %v634_v61 = vshrl.u32 %v2764_v59, 16  ;;  %v617_v62 = vshrl.u32 %v2762_v60, 16  ;;  %v668_v63 = vshrl.u32 %v2768_v58, 16  ;;  %v651_v1 = vshrl.u32 %v2766_v56, 16 }
 0x189   : > { %v637_v4 = vshll.u32 %v2764_v59, 16  ;;  %v620_v5 = vshll.u32 %v2762_v60, 16  ;;  %v671_v14 = vshll.u32 %v2768_v58, 16  ;;  %v654_v15 = vshll.u32 %v2766_v56, 16 }
 0x18a   : > { %v636_v2 = vrot.slane %v634_v61, 7  ;;  %v619_v3 = vrot.slane %v617_v62, 7  ;;  %v670_v10 = vrot.slane %v668_v63, 7  ;;  %v653_v11 = vrot.slane %v651_v1, 7 }
 0x18c   : > { %v641_v6 = vrot.slane %v636_v2, 4  ;;  %v624_v7 = vrot.slane %v619_v3, 4  ;;  %v639_v8 = vor.u32 %v637_v4, %v636_v2  ;;  %v622_v9 = vor.u32 %v620_v5, %v619_v3 }
 0x18d   : > { %v673_v18 = vor.u32 %v671_v14, %v670_v10  ;;  %v656_v19 = vor.u32 %v654_v15, %v653_v11  ;;  %v675_v24 = vrot.slane %v670_v10, 4  ;;  %v658_v25 = vrot.slane %v653_v11, 4 }
 0x18e   : > { %686 = vrot.lane.b32.xlu0 %v641_v6, %s2858_s18  ;;  %680 = vrot.lane.b32.xlu1 %v624_v7, %s2858_s18  ;;  %v640_v16 = vsel %vm607_vm12, %v632_v12, %v639_v8  ;;  %v623_v17 = vsel %vm607_vm12, %v615_v13, %v622_v9 }
 0x18f   : > { %v674_v22 = vsel %vm607_vm12, %v666_v20, %v673_v18  ;;  %v657_v23 = vsel %vm607_vm12, %v649_v21, %v656_v19  ;;  %vm2560_vm12 = vcmask 31744  }
 0x192   : > { %684 = vrot.lane.b32.xlu0 %v640_v16, %s2858_s18  ;;  %678 = vrot.lane.b32.xlu1 %v623_v17, %s2858_s18 }
 0x196   : > { %696 = vrot.lane.b32.xlu0 %v674_v22, %s2858_s18  ;;  %690 = vrot.lane.b32.xlu1 %v657_v23, %s2858_s18 }
 0x19a   : > { %698 = vrot.lane.b32.xlu0 %v675_v24, %s2858_s18  ;;  %692 = vrot.lane.b32.xlu1 %v658_v25, %s2858_s18 }
 0x1f4   : > { %v683_v29 = vpop.permute.xlu0 %682 }
 0x1f5   : > { %v677_v30 = vpop.permute.xlu1 %676  ;;  %v725_v31 = vsel %vm3059_vm14, %v683_v29, %v724_v27 }
 0x1f6   : > { %v715_v32 = vsel %vm3059_vm14, %v677_v30, %v714_v28  ;;  %726 = vst [vmem:[#allocation2 + $0xc] sm:$0xf] %v725_v31 }
 0x1f7   : > { %716 = vst [vmem:[#allocation2] sm:$0xf] %v715_v32 }
 0x1f8   : > { %v695_v35 = vpop.permute.xlu0 %694 }
 0x1f9   : > { %v689_v36 = vpop.permute.xlu1 %688  ;;  %v739_v37 = vsel %vm3059_vm14, %v695_v35, %v738_v33 }
 0x1fa   : > { %v732_v38 = vsel %vm3059_vm14, %v689_v36, %v731_v34  ;;  %740 = vst [vmem:[#allocation2 + $0x24] sm:$0xf] %v739_v37 }
 0x1fb   : > { %733 = vst [vmem:[#allocation2 + $0x18] sm:$0xf] %v732_v38 }
 0x1fd   : > { %v747_v63 = vld [vmem:[#allocation2 + $0xc] sm:$0xf] }
 0x1fe   : > { %v745_v58 = vld [vmem:[#allocation2] sm:$0xf]  ;;  %v875_v7 = vld [vmem:[#allocation2 + $0xc] sm:$0xf] }
 0x1ff   : > { %v872_v59 = vld [vmem:[#allocation2] sm:$0xf]  ;;  %v1195_v8 = vld [vmem:[#allocation2 + $0xc] sm:$0xe] }
 0x200   : > { %v681_v43 = vpop.permute.xlu1 %680  ;;  %v687_v44 = vpop.permute.xlu0 %686  ;;  %v1192_v62 = vld [vmem:[#allocation2] sm:$0xe] }
 0x201   : > { %v722_v45 = vsel %vm3072_vm0, %v681_v43, %v721_v40  ;;  %v729_v46 = vsel %vm3072_vm0, %v687_v44, %v728_v41  ;;  %v751_v32 = vld [vmem:[#allocation2 + $0x24] sm:$0xf] }
 0x202   : > { %723 = vst [vmem:[#allocation2 + $0x8] sm:$0x1] %v722_v45  ;;  %730 = vst [vmem:[#allocation2 + $0x14] sm:$0x1] %v729_v46  ;;  %v749_v16 = vld [vmem:[#allocation2 + $0x18] sm:$0xf] }
 0x203   : > { %v878_v17 = vld [vmem:[#allocation2 + $0x18] sm:$0xf]  ;;  %v881_v37 = vld [vmem:[#allocation2 + $0x24] sm:$0xf] }
 0x204   : > { %v679_v47 = vpop.permute.xlu1 %678  ;;  %v685_v48 = vpop.permute.xlu0 %684  ;;  %v1198_v29 = vld [vmem:[#allocation2 + $0x18] sm:$0xe]  ;;  %v1201_v38 = vld [vmem:[#allocation2 + $0x24] sm:$0xe] }
 0x205   : > { %718 = vst.msk [vmem:[#allocation2 + $0x4] sm:$0xf] %vm712_vm13, %v679_v47  ;;  %727 = vst.msk [vmem:[#allocation2 + $0x10] sm:$0xf] %vm712_vm13, %v685_v48 }
 0x208   : > { %v691_v49 = vpop.permute.xlu1 %690  ;;  %v697_v50 = vpop.permute.xlu0 %696 }
 0x209   : > { %v2792_v53 = vld [vmem:[#allocation2 + $0x8] ss:$0 sps:$4 sm:$0x11]   ;;  %734 = vst.msk [vmem:[#allocation2 + $0x1c] sm:$0xf] %vm712_vm13, %v691_v49 }
 0x20a   : > { %741 = vst.msk [vmem:[#allocation2 + $0x28] sm:$0xf] %vm712_vm13, %v697_v50  ;;  %v3084_v54 = vld [vmem:[#allocation2 + $0x8] ss:$0 sps:$4 sm:$0x11]   ;;  %v925_v55 = vshll.u32 %v2792_v53, 16 }
 0x20b   : > { %v2794_v56 = vld [vmem:[#allocation2 + $0x14] ss:$0 sps:$4 sm:$0x11]   ;;  %v1238_v60 = vrot.slane %v3084_v54, 1 }
 0x20c   : > { %v3087_v61 = vld [vmem:[#allocation2 + $0x14] ss:$0 sps:$4 sm:$0x11]   ;;  %v693_v1 = vpop.permute.xlu1 %692  ;;  %v699_v2 = vpop.permute.xlu0 %698  ;;  %v3089_v3 = vrot.slane %v925_v55, 1  ;;  %v937_v4 = vshll.u32 %v2794_v56, 16  ;;  %v2800_v18 = vld [vmem:[#allocation2] sm:$0xff]  }
 0x20d   : > { %v746_v5 = vld [vmem:[#allocation2 + $0x4] sm:$0xf]  ;;  %v736_v9 = vsel %vm3072_vm0, %v693_v1, %v735_v51  ;;  %v743_v10 = vsel %vm3072_vm0, %v699_v2, %v742_v52  ;;  %v1241_v11 = vrot.slane %v3087_v61, 1  ;;  %v748_v15 = vld [vmem:[#allocation2 + $0x10] sm:$0xf]  ;;  %810 = vrot.lane.b32.xlu1 %v2800_v18, %s2859_s19 }
 0x20e   : > { %v873_v6 = vld [vmem:[#allocation2 + $0x4] sm:$0xf]  ;;  %v2693_v12 = vcombine.low %v745_v58, %v746_v5  ;;  %737 = vst [vmem:[#allocation2 + $0x20] sm:$0x1] %v736_v9  ;;  %744 = vst [vmem:[#allocation2 + $0x2c] sm:$0x1] %v743_v10  ;;  %v2694_v21 = vcombine.low %v747_v63, %v748_v15 }
 0x20f   : > { %v2705_v13 = vcombine.low %v872_v59, %v873_v6  ;;  %v1193_v14 = vld [vmem:[#allocation2 + $0x4] sm:$0xf]  ;;  %v3096_v19 = vrot.slane %v937_v4, 1  ;;  %v876_v22 = vld [vmem:[#allocation2 + $0x10] sm:$0xf] }
 0x210   : > { %v2729_v20 = vcombine.low %v1192_v62, %v1193_v14  ;;  %v1196_v23 = vld [vmem:[#allocation2 + $0x10] sm:$0xf]  ;;  %778 = vst.msk [vmem:[#allocation3] sm:$0xff] %vm777_vm1, %v2693_v12  ;;  %v2707_v27 = vcombine.low %v875_v7, %v876_v22  ;;  %v750_v30 = vld [vmem:[#allocation2 + $0x1c] sm:$0xf]  ;;  %779 = vst.msk [vmem:[#allocation3 + $0x8] sm:$0xff] %vm777_vm1, %v2694_v21 }
 0x211   : > { %v2801_v24 = vld [vmem:[#allocation2 + $0xc] sm:$0xff]   ;;  %v918_v25 = vshrl.u32 %v2705_v13, 16  ;;  %v920_v26 = vshll.u32 %v2705_v13, 16  ;;  %v2731_v28 = vcombine.low %v1195_v8, %v1196_v23  ;;  %v879_v31 = vld [vmem:[#allocation2 + $0x1c] sm:$0xf]  ;;  %v2695_v34 = vcombine.low %v749_v16, %v750_v30  ;;  %v2803_v58 = vld [vmem:[#allocation2 + $0x24] sm:$0xff]  }
 0x212   : > { %v1237_v33 = vrot.slane %v2729_v20, 1  ;;  %v2709_v35 = vcombine.low %v878_v17, %v879_v31  ;;  %v1199_v36 = vld [vmem:[#allocation2 + $0x1c] sm:$0xf]  ;;  %v752_v39 = vld [vmem:[#allocation2 + $0x28] sm:$0xf]  ;;  %812 = vrot.lane.b32.xlu0 %v2801_v24, %s2859_s19  ;;  %v930_v43 = vshrl.u32 %v2707_v27, 16 }
 0x213   : > { %v2802_v40 = vld [vmem:[#allocation2 + $0x18] sm:$0xff]   ;;  %v922_v41 = vrot.slane %v920_v26, 1  ;;  %v932_v44 = vshll.u32 %v2707_v27, 16  ;;  %v1240_v45 = vrot.slane %v2731_v28, 1  ;;  %v882_v46 = vld [vmem:[#allocation2 + $0x28] sm:$0xf]  ;;  %v2733_v49 = vcombine.low %v1198_v29, %v1199_v36 }
 0x214   : > { %780 = vst.msk [vmem:[#allocation3 + $0x10] sm:$0xff] %vm777_vm1, %v2695_v34  ;;  %v942_v47 = vshrl.u32 %v2709_v35, 16  ;;  %v944_v48 = vshll.u32 %v2709_v35, 16  ;;  %v2696_v50 = vcombine.low %v751_v32, %v752_v39  ;;  %v1202_v51 = vld [vmem:[#allocation2 + $0x28] sm:$0xf]  ;;  %v2711_v55 = vcombine.low %v881_v37, %v882_v46  ;;  %814 = vrot.lane.b32.xlu1 %v2802_v40, %s2859_s19  ;;  %v2804_v8 = vld [vmem:[#allocation2] sm:$0xff]  }
 0x215   : > { %v923_v52 = vor.u32 %v922_v41, %v918_v25  ;;  %v934_v53 = vrot.slane %v932_v44, 1  ;;  %v2735_v56 = vcombine.low %v1201_v38, %v1202_v51  ;;  %v1243_v61 = vrot.slane %v2733_v49, 1  ;;  %v2796_v6 = vld [vmem:[#allocation2 + $0x20] ss:$0 sps:$4 sm:$0x11]   ;;  %v2806_v18 = vld [vmem:[#allocation2 + $0x18] sm:$0xff]  }
 0x216   : > { %v946_v59 = vrot.slane %v944_v48, 1  ;;  %781 = vst.msk [vmem:[#allocation3 + $0x18] sm:$0xff] %vm777_vm1, %v2696_v50  ;;  %v1239_v62 = vsel %vm1236_vm2, %v1237_v33, %v1238_v60  ;;  %v1242_v63 = vsel %vm1236_vm2, %v1240_v45, %v1241_v11  ;;  %v954_v2 = vshrl.u32 %v2711_v55, 16  ;;  %816 = vrot.lane.b32.xlu0 %v2803_v58, %s2859_s19  ;;  %v2797_v7 = vld [vmem:[#allocation2 + $0x20] ss:$0 sps:$4 sm:$0x11]  }
 0x217   : > { %v935_v1 = vor.u32 %v934_v53, %v930_v43  ;;  %v956_v4 = vshll.u32 %v2711_v55, 16  ;;  %v1246_v5 = vrot.slane %v2735_v56, 1  ;;  %1254 = vst.msk [vmem:[#allocation3 + $0xc0] sm:$0xff] %vm777_vm1, %v1239_v62  ;;  %1255 = vst.msk [vmem:[#allocation3 + $0xc8] sm:$0xff] %vm777_vm1, %v1242_v63  ;;  %v928_v54 = vsel %vm916_vm3, %v923_v52, %v3089_v3  ;;  %v2805_v11 = vld [vmem:[#allocation2 + $0xc] sm:$0xff]   ;;  %v2807_v22 = vld [vmem:[#allocation2 + $0x24] sm:$0xff]  }
 0x218   : > { %v949_v60 = vshll.u32 %v2796_v6, 16  ;;  %v2798_v10 = vld [vmem:[#allocation2 + $0x2c] ss:$0 sps:$4 sm:$0x11]   ;;  %970 = vst.msk [vmem:[#allocation3 + $0x60] sm:$0xff] %vm777_vm1, %v928_v54  ;;  %v1244_v13 = vrot.slane %v2797_v7, 1  ;;  %855 = vrot.lane.b32.xlu1 %v2804_v8, %s2860_s20  ;;  %v947_v15 = vor.u32 %v946_v59, %v942_v47 }
 0x219   : > { %v958_v9 = vrot.slane %v956_v4, 1  ;;  %v940_v12 = vsel %vm916_vm3, %v935_v1, %v3096_v19  ;;  %v2799_v14 = vld [vmem:[#allocation2 + $0x2c] ss:$0 sps:$4 sm:$0x11]   ;;  %v961_v17 = vshll.u32 %v2798_v10, 16  ;;  %v2816_v27 = vld [vmem:[#allocation2] sm:$0xff]  }
 0x21a   : > { %971 = vst.msk [vmem:[#allocation3 + $0x68] sm:$0xff] %vm777_vm1, %v940_v12  ;;  %v951_v16 = vrot.slane %v949_v60, 1  ;;  %857 = vrot.lane.b32.xlu0 %v2805_v11, %s2860_s20  ;;  %v1247_v3 = vrot.slane %v2799_v14, 1  ;;  %v1245_v20 = vsel %vm1236_vm2, %v1243_v61, %v1244_v13  ;;  %v2808_v24 = vld [vmem:[#allocation2] sm:$0xfe]   ;;  %v1019_v33 = vshrl.u32 %v2816_v27, 16 }
 0x21b   : > { %v959_v21 = vor.u32 %v958_v9, %v954_v2  ;;  %v963_v19 = vrot.slane %v961_v17, 1  ;;  %1256 = vst.msk [vmem:[#allocation3 + $0xd0] sm:$0xff] %vm777_vm1, %v1245_v20  ;;  %v2809_v26 = vld [vmem:[#allocation2 + $0x8] ss:$0 sps:$4 sm:$0x11]   ;;  %v1302_v29 = vrot.slane %v2808_v24, 1 }
 0x21c   : > { %v952_v23 = vsel %vm916_vm3, %v947_v15, %v951_v16  ;;  %859 = vrot.lane.b32.xlu1 %v2806_v18, %s2860_s20  ;;  %v1248_v25 = vsel %vm1236_vm2, %v1246_v5, %v1247_v3  ;;  %v2810_v30 = vld [vmem:[#allocation2 + $0xc] sm:$0xfe]   ;;  %v2811_v31 = vld [vmem:[#allocation2 + $0x14] ss:$0 sps:$4 sm:$0x11]   ;;  %v1303_v32 = vrot.slane %v2809_v26, 1 }
 0x21d   : > { %972 = vst.msk [vmem:[#allocation3 + $0x70] sm:$0xff] %vm777_vm1, %v952_v23  ;;  %v964_v28 = vsel %vm916_vm3, %v959_v21, %v963_v19  ;;  %1257 = vst.msk [vmem:[#allocation3 + $0xd8] sm:$0xff] %vm777_vm1, %v1248_v25  ;;  %v1305_v34 = vrot.slane %v2810_v30, 1  ;;  %v1306_v35 = vrot.slane %v2811_v31, 1  ;;  %v2812_v36 = vld [vmem:[#allocation2 + $0x18] sm:$0xfe]  }
 0x21e   : > { %861 = vrot.lane.b32.xlu0 %v2807_v22, %s2860_s20  ;;  %973 = vst.msk [vmem:[#allocation3 + $0x78] sm:$0xff] %vm777_vm1, %v964_v28  ;;  %v1304_v37 = vsel %vm1236_vm2, %v1302_v29, %v1303_v32  ;;  %v2813_v38 = vld [vmem:[#allocation2 + $0x20] ss:$0 sps:$4 sm:$0x11]   ;;  %v1021_v39 = vshll.u32 %v2816_v27, 16  ;;  %v1308_v41 = vrot.slane %v2812_v36, 1 }
 0x21f   : > { %v1307_v40 = vsel %vm1236_vm2, %v1305_v34, %v1306_v35  ;;  %v2814_v43 = vld [vmem:[#allocation2 + $0x24] sm:$0xfe]   ;;  %v2815_v44 = vld [vmem:[#allocation2 + $0x2c] ss:$0 sps:$4 sm:$0x11]   ;;  %v1309_v45 = vrot.slane %v2813_v38, 1 }
 0x220   : > { %1314 = vrot.lane.b32.xlu1 %v1304_v37, %s2859_s19  ;;  %v1023_v46 = vrot.slane %v1021_v39, 1  ;;  %v1311_v47 = vrot.slane %v2814_v43, 1  ;;  %v1312_v48 = vrot.slane %v2815_v44, 1  ;;  %v2817_v49 = vld [vmem:[#allocation2 + $0x8] ss:$0 sps:$4 sm:$0x11]  }
 0x221   : > { %v2818_v50 = vld [vmem:[#allocation2 + $0xc] sm:$0xff]   ;;  %v1310_v51 = vsel %vm1236_vm2, %v1308_v41, %v1309_v45  ;;  %v1026_v55 = vshll.u32 %v2817_v49, 16  ;;  %v2819_v56 = vld [vmem:[#allocation2 + $0x14] ss:$0 sps:$4 sm:$0x11]   ;;  %v2820_v61 = vld [vmem:[#allocation2 + $0x18] sm:$0xff]  }
 0x222   : > { %1316 = vrot.lane.b32.xlu0 %v1307_v40, %s2859_s19  ;;  %v1024_v52 = vor.u32 %v1023_v46, %v1019_v33  ;;  %v1313_v53 = vsel %vm1236_vm2, %v1311_v47, %v1312_v48  ;;  %v1031_v58 = vshrl.u32 %v2818_v50, 16  ;;  %v1033_v59 = vshll.u32 %v2818_v50, 16  ;;  %v2821_v62 = vld [vmem:[#allocation2 + $0x20] ss:$0 sps:$4 sm:$0x11]   ;;  %v2822_v4 = vld [vmem:[#allocation2 + $0x24] sm:$0xff]  }
 0x223   : > { %v1028_v63 = vrot.slane %v1026_v55, 1  ;;  %v1038_v2 = vshll.u32 %v2819_v56, 16  ;;  %v1043_v5 = vshrl.u32 %v2820_v61, 16  ;;  %v1045_v6 = vshll.u32 %v2820_v61, 16  ;;  %v2824_v8 = vld [vmem:[#allocation2] sm:$0xff]   ;;  %v2826_v12 = vld [vmem:[#allocation2 + $0xc] sm:$0xff]  }
 0x224   : > { %1318 = vrot.lane.b32.xlu1 %v1310_v51, %s2859_s19  ;;  %v1035_v1 = vrot.slane %v1033_v59, 1  ;;  %v1050_v7 = vshll.u32 %v2821_v62, 16  ;;  %v2823_v10 = vld [vmem:[#allocation2 + $0x2c] ss:$0 sps:$4 sm:$0x11]   ;;  %v1055_v11 = vshrl.u32 %v2822_v4, 16 }
 0x225   : > { %v1029_v54 = vsel %vm916_vm3, %v1024_v52, %v1028_v63  ;;  %v1040_v60 = vrot.slane %v1038_v2, 1  ;;  %v1047_v13 = vrot.slane %v1045_v6, 1  ;;  %v1057_v15 = vshll.u32 %v2822_v4, 16  ;;  %v2825_v18 = vld [vmem:[#allocation2 + $0x8] ss:$0 sps:$4 sm:$0x11]  }
 0x226   : > { %1320 = vrot.lane.b32.xlu0 %v1313_v53, %s2859_s19  ;;  %v1036_v9 = vor.u32 %v1035_v1, %v1031_v58  ;;  %v1052_v14 = vrot.slane %v1050_v7, 1  ;;  %v1128_v16 = vshrl.u32 %v2824_v8, 16  ;;  %v1062_v3 = vshll.u32 %v2823_v10, 16  ;;  %v2827_v24 = vld [vmem:[#allocation2 + $0x14] ss:$0 sps:$4 sm:$0x11]  }
 0x227   : > { %v1048_v20 = vor.u32 %v1047_v13, %v1043_v5  ;;  %v1059_v21 = vrot.slane %v1057_v15, 1  ;;  %v1130_v19 = vshll.u32 %v2824_v8, 16  ;;  %v1135_v23 = vshll.u32 %v2825_v18, 16  ;;  %v2828_v32 = vld [vmem:[#allocation2 + $0x18] sm:$0xff]   ;;  %v2830_v37 = vld [vmem:[#allocation2 + $0x24] sm:$0xff]  }
 0x228   : > { %1066 = vrot.lane.b32.xlu1 %v1029_v54, %s2859_s19  ;;  %v1041_v17 = vsel %vm916_vm3, %v1036_v9, %v1040_v60  ;;  %v1064_v22 = vrot.slane %v1062_v3, 1  ;;  %v1140_v25 = vshrl.u32 %v2826_v12, 16  ;;  %v1142_v29 = vshll.u32 %v2826_v12, 16  ;;  %v2829_v33 = vld [vmem:[#allocation2 + $0x20] ss:$0 sps:$4 sm:$0x11]  }
 0x229   : > { %v1053_v26 = vsel %vm916_vm3, %v1048_v20, %v1052_v14  ;;  %v1060_v27 = vor.u32 %v1059_v21, %v1055_v11  ;;  %v1132_v28 = vrot.slane %v1130_v19, 1  ;;  %v1137_v30 = vrot.slane %v1135_v23, 1  ;;  %v2831_v45 = vld [vmem:[#allocation2 + $0x2c] ss:$0 sps:$4 sm:$0x11]  }
 0x22a   : > { %1068 = vrot.lane.b32.xlu0 %v1041_v17, %s2859_s19  ;;  %v1147_v31 = vshll.u32 %v2827_v24, 16  ;;  %v1144_v36 = vrot.slane %v1142_v29, 1  ;;  %v1154_v39 = vshll.u32 %v2828_v32, 16  ;;  %v1159_v40 = vshll.u32 %v2829_v33, 16  ;;  %v2832_v49 = vld [vmem:[#allocation2] sm:$0xfe]  }
 0x22b   : > { %v1065_v34 = vsel %vm916_vm3, %v1060_v27, %v1064_v22  ;;  %v1133_v35 = vor.u32 %v1132_v28, %v1128_v16  ;;  %v1152_v44 = vshrl.u32 %v2828_v32, 16  ;;  %v1166_v46 = vshll.u32 %v2830_v37, 16  ;;  %v2833_v55 = vld [vmem:[#allocation2 + $0x8] ss:$0 sps:$4 sm:$0x11]   ;;  %v3170_v24 = vld [vmem:[#allocation3 + $0x10] sm:$0xff] }
 0x22c   : > { %1070 = vrot.lane.b32.xlu1 %v1053_v26, %s2859_s19  ;;  %v1149_v38 = vrot.slane %v1147_v31, 1  ;;  %v1145_v43 = vor.u32 %v1144_v36, %v1140_v25  ;;  %v1156_v47 = vrot.slane %v1154_v39, 1  ;;  %v1161_v48 = vrot.slane %v1159_v40, 1  ;;  %v2834_v61 = vld [vmem:[#allocation2 + $0xc] sm:$0xfe]   ;;  %v3188_v32 = vld [vmem:[#allocation3 + $0x8] sm:$0xff] }
 0x22d   : > { %v1138_v41 = vsel %vm916_vm3, %v1133_v35, %v1137_v30  ;;  %v1164_v51 = vshrl.u32 %v2830_v37, 16  ;;  %v1168_v52 = vrot.slane %v1166_v46, 1  ;;  %v1171_v53 = vshll.u32 %v2831_v45, 16  ;;  %v2835_v1 = vld [vmem:[#allocation2 + $0x14] ss:$0 sps:$4 sm:$0x11]  }
 0x22e   : > { %1072 = vrot.lane.b32.xlu0 %v1065_v34, %s2859_s19  ;;  %v1150_v50 = vsel %vm916_vm3, %v1145_v43, %v1149_v38  ;;  %v1157_v56 = vor.u32 %v1156_v47, %v1152_v44  ;;  %v1375_v63 = vrot.slane %v2832_v49, 1  ;;  %v1376_v4 = vrot.slane %v2833_v55, 1  ;;  %v2837_v6 = vld [vmem:[#allocation2 + $0x20] ss:$0 sps:$4 sm:$0x11]   ;;  %v3172_v25 = vld [vmem:[#allocation3 + $0x18] sm:$0xff] }
 0x22f   : > { %v1169_v58 = vor.u32 %v1168_v52, %v1164_v51  ;;  %v1173_v59 = vrot.slane %v1171_v53, 1  ;;  %v1378_v5 = vrot.slane %v2834_v61, 1  ;;  %v2836_v7 = vld [vmem:[#allocation2 + $0x18] sm:$0xfe]   ;;  %v1379_v8 = vrot.slane %v2835_v1, 1  ;;  %v3186_v31 = vld [vmem:[#allocation3] sm:$0xff] }
 0x230   : > { %1175 = vrot.lane.b32.xlu1 %v1138_v41, %s2860_s20  ;;  %v1162_v62 = vsel %vm916_vm3, %v1157_v56, %v1161_v48  ;;  %v2838_v54 = vld [vmem:[#allocation2 + $0x24] sm:$0xfe]   ;;  %v1377_v9 = vsel %vm1236_vm2, %v1375_v63, %v1376_v4  ;;  %v1382_v60 = vrot.slane %v2837_v6, 1  ;;  %v2839_v10 = vld [vmem:[#allocation2 + $0x2c] ss:$0 sps:$4 sm:$0x11]   ;;  %v1450_v34 = vpack.i.b16 %v3172_v25, %v3170_v24 }
 0x231   : > { %v1174_v2 = vsel %vm916_vm3, %v1169_v58, %v1173_v59  ;;  %v1380_v11 = vsel %vm1236_vm2, %v1378_v5, %v1379_v8  ;;  %v1381_v12 = vrot.slane %v2836_v7, 1  ;;  %v1385_v13 = vrot.slane %v2839_v10, 1  ;;  %v3198_v37 = vld [vmem:[#allocation3 + $0x60] sm:$0xff]  ;;  %v3200_v38 = vld [vmem:[#allocation3 + $0x68] sm:$0xff]  ;;  %v3208_v45 = vld [vmem:[#allocation3 + $0x70] sm:$0xff] }
 0x232   : > { %1177 = vrot.lane.b32.xlu0 %v1150_v50, %s2860_s20  ;;  %v1384_v14 = vrot.slane %v2838_v54, 1  ;;  %v1442_v40 = vpack.i.b16 %v3188_v32, %v3186_v31  ;;  %v3210_v46 = vld [vmem:[#allocation3 + $0x78] sm:$0xff]  ;;  %v1490_v48 = vpack.i.b16 %v3200_v38, %v3198_v37 }
 0x233   : > { %v1383_v15 = vsel %vm1236_vm2, %v1381_v12, %v1382_v60  ;;  %v1498_v53 = vpack.i.b16 %v3210_v46, %v3208_v45 }
 0x234   : > { %1179 = vrot.lane.b32.xlu1 %v1162_v62, %s2860_s20  ;;  %v1386_v16 = vsel %vm1236_vm2, %v1384_v14, %v1385_v13 }
 0x236   : > { %1181 = vrot.lane.b32.xlu0 %v1174_v2, %s2860_s20 }
 0x238   : > { %1387 = vrot.lane.b32.xlu1 %v1377_v9, %s2860_s20 }
 0x23a   : > { %1389 = vrot.lane.b32.xlu0 %v1380_v11, %s2860_s20 }
 0x23c   : > { %1391 = vrot.lane.b32.xlu1 %v1383_v15, %s2860_s20 }
 0x23e   : > { %1393 = vrot.lane.b32.xlu0 %v1386_v16, %s2860_s20 }
 0x27f   : > { %v811_v17 = vpop.permute.xlu1 %810 }
 0x280   : > { %823 = vst.msk [vmem:[#allocation3 + $0x20] sm:$0xff] %vm777_vm1, %v811_v17 }
 0x284   : > { %v813_v3 = vpop.permute.xlu0 %812 }
 0x285   : > { %824 = vst.msk [vmem:[#allocation3 + $0x28] sm:$0xff] %vm777_vm1, %v813_v3 }
 0x286   : > { %v815_v18 = vpop.permute.xlu1 %814 }
 0x287   : > { %825 = vst.msk [vmem:[#allocation3 + $0x30] sm:$0xff] %vm777_vm1, %v815_v18  ;;  %v3175_v27 = vld [vmem:[#allocation3 + $0x20] sm:$0xff] }
 0x288   : > { %v817_v20 = vpop.permute.xlu0 %816 }
 0x289   : > { %826 = vst.msk [vmem:[#allocation3 + $0x38] sm:$0xff] %vm777_vm1, %v817_v20 }
 0x28a   : > { %v856_v21 = vpop.permute.xlu1 %855 }
 0x28b   : > { %868 = vst.msk [vmem:[#allocation3 + $0x40] sm:$0xff] %vm777_vm1, %v856_v21 }
 0x28c   : > { %v858_v19 = vpop.permute.xlu0 %857  ;;  %v3177_v28 = vld [vmem:[#allocation3 + $0x28] sm:$0xff] }
 0x28d   : > { %869 = vst.msk [vmem:[#allocation3 + $0x48] sm:$0xff] %vm777_vm1, %v858_v19  ;;  %v1458_v35 = vpack.i.b16 %v3177_v28, %v3175_v27 }
 0x28e   : > { %v3168_v22 = vld [vmem:[#allocation3 + $0x30] sm:$0xff]  ;;  %v860_v23 = vpop.permute.xlu1 %859 }
 0x28f   : > { %870 = vst.msk [vmem:[#allocation3 + $0x50] sm:$0xff] %vm777_vm1, %v860_v23  ;;  %v1591_v49 = vcombine.high %v1442_v40, %v1458_v35  ;;  %v1590_v3 = vcombine.low %v1442_v40, %v1458_v35 }
 0x290   : > { %v862_v26 = vpop.permute.xlu0 %861  ;;  %v3179_v29 = vld [vmem:[#allocation3 + $0x38] sm:$0xff] }
 0x291   : > { %871 = vst.msk [vmem:[#allocation3 + $0x58] sm:$0xff] %vm777_vm1, %v862_v26  ;;  %v3184_v30 = vpack.i.b16 %v3179_v29, %v3168_v22  ;;  %v1605_v59 = vrot.slane %v1591_v49, %v2992_v42  ;;  %v3264_v23 = vrot.slane %v1590_v3, %v2992_v42 }
 0x292   : > { %v3190_v33 = vld [vmem:[#allocation3 + $0x40] sm:$0xff]  ;;  %v1315_v39 = vpop.permute.xlu1 %1314 }
 0x293   : > { %v1607_v43 = vcombine.high %v1450_v34, %v3184_v30  ;;  %1327 = vst.msk [vmem:[#allocation3 + $0xe0] sm:$0xff] %vm777_vm1, %v1315_v39  ;;  %v1606_v14 = vcombine.low %v1450_v34, %v3184_v30 }
 0x294   : > { %v3196_v36 = vld [vmem:[#allocation3 + $0x48] sm:$0xff]  ;;  %v1317_v44 = vpop.permute.xlu0 %1316 }
 0x295   : > { %v1474_v41 = vpack.i.b16 %v3196_v36, %v3190_v33  ;;  %1328 = vst.msk [vmem:[#allocation3 + $0xe8] sm:$0xff] %vm777_vm1, %v1317_v44  ;;  %v1621_v55 = vrot.slane %v1607_v43, %v2992_v42  ;;  %v3257_v21 = vrot.slane %v1606_v14, %v2992_v42  ;;  %v1469_v43 = vshrl.u32 %v3179_v29, 16 }
 0x296   : > { %v3213_v47 = vld [vmem:[#allocation3 + $0x50] sm:$0xff]  ;;  %v1319_v51 = vpop.permute.xlu1 %1318 }
 0x297   : > { %v1623_v56 = vcombine.high %v1474_v41, %v1490_v48  ;;  %1329 = vst.msk [vmem:[#allocation3 + $0xf0] sm:$0xff] %vm777_vm1, %v1319_v51  ;;  %v1670_v1 = vcombine.low %v1605_v59, %v1621_v55  ;;  %v1671_v54 = vcombine.high %v1605_v59, %v1621_v55  ;;  %v1622_v15 = vcombine.low %v1474_v41, %v1490_v48 }
 0x298   : > { %v3217_v50 = vld [vmem:[#allocation3 + $0x58] sm:$0xff]  ;;  %v1321_v58 = vpop.permute.xlu0 %1320  ;;  %v1654_v35 = vcombine.low %v3264_v23, %v3257_v21  ;;  %v1468_v41 = vshrl.u32 %v3168_v22, 16  ;;  %v1452_v51 = vshrl.u32 %v3170_v24, 16  ;;  %v1461_v55 = vshrl.u32 %v3177_v28, 16  ;;  %v3302_v28 = vld [vmem:[#allocation3 + $0xd0] sm:$0xff] }
 0x299   : > { %v1482_v52 = vpack.i.b16 %v3217_v50, %v3213_v47  ;;  %1330 = vst.msk [vmem:[#allocation3 + $0xf8] sm:$0xff] %vm777_vm1, %v1321_v58  ;;  %v1637_v62 = vrot.slane %v1623_v56, %v2992_v42  ;;  %v3232_v7 = vrot.slane %v1670_v1, %v3007_v57  ;;  %v3245_v13 = vrot.slane %v1671_v54, %v3007_v57  ;;  %v3304_v1 = vld [vmem:[#allocation3 + $0xd8] sm:$0xff] }
 0x29a   : > { %v1067_v2 = vpop.permute.xlu1 %1066  ;;  %v3260_v19 = vrot.slane %v1622_v15, %v2992_v42  ;;  %v3279_v48 = vrot.slane %v1654_v35, %v3007_v57  ;;  %v3290_v56 = vpack.i.b16 %v1469_v43, %v1468_v41  ;;  %v1484_v58 = vshrl.u32 %v3213_v47, 16  ;;  %v3338_v15 = vld [vmem:[#allocation3 + $0xe0] sm:$0xff] }
 0x29b   : > { %v1639_v61 = vcombine.high %v1482_v52, %v1498_v53  ;;  %1079 = vst.msk [vmem:[#allocation3 + $0x80] sm:$0xff] %vm777_vm1, %v1067_v2  ;;  %3784 = vst [vmem:[#allocation4_spill] sm:$0xff] %v3232_v7  ;;  %v1638_v11 = vcombine.low %v1482_v52, %v1498_v53  ;;  %v1453_v52 = vshrl.u32 %v3172_v25, 16  ;;  %v1460_v53 = vshrl.u32 %v3175_v27, 16 }
 0x29c   : > { %v1069_v6 = vpop.permute.xlu0 %1068  ;;  %3787 = vst [vmem:[#allocation7_spill] sm:$0xff] %v3279_v48  ;;  %v1485_v59 = vshrl.u32 %v3217_v50, 16  ;;  %v1444_v25 = vshrl.u32 %v3186_v31, 16  ;;  %v1445_v27 = vshrl.u32 %v3188_v32, 16  ;;  %v1493_v50 = vshrl.u32 %v3200_v38, 16  ;;  %v3354_v41 = vld [vmem:[#allocation3 + $0xe8] sm:$0xff] }
 0x29d   : > { %v1653_v63 = vrot.slane %v1639_v61, %v2992_v42  ;;  %1080 = vst.msk [vmem:[#allocation3 + $0x88] sm:$0xff] %vm777_vm1, %v1069_v6  ;;  %v3252_v18 = vrot.slane %v1638_v11, %v2992_v42  ;;  %v3294_v61 = vld [vmem:[#allocation3 + $0xc0] sm:$0xff]  ;;  %v3307_v47 = vpack.i.b16 %v1453_v52, %v1452_v51  ;;  %v1500_v2 = vshrl.u32 %v3208_v45, 16 }
 0x29e   : > { %v1071_v9 = vpop.permute.xlu1 %1070  ;;  %v1501_v31 = vshrl.u32 %v3210_v46, 16  ;;  %v1477_v6 = vshrl.u32 %v3196_v36, 16  ;;  %v3326_v45 = vpack.i.b16 %v1461_v55, %v1460_v53  ;;  %v3328_v46 = vpack.i.b16 %v1485_v59, %v1484_v58 }
 0x29f   : > { %v1702_v4 = vcombine.low %v1637_v62, %v1653_v63  ;;  %v1703_v5 = vcombine.high %v1637_v62, %v1653_v63  ;;  %1081 = vst.msk [vmem:[#allocation3 + $0x90] sm:$0xff] %vm777_vm1, %v1071_v9  ;;  %v1686_v26 = vcombine.low %v3260_v19, %v3252_v18  ;;  %v1492_v62 = vshrl.u32 %v3198_v37, 16  ;;  %v3300_v63 = vld [vmem:[#allocation3 + $0xc8] sm:$0xff]  ;;  %v3316_v37 = vld [vmem:[#allocation3 + $0xf0] sm:$0xff] }
 0x2a0   : > { %v1073_v12 = vpop.permute.xlu0 %1072  ;;  %v1743_v11 = vcombine.high %v3307_v47, %v3290_v56  ;;  %v3336_v36 = vpack.i.b16 %v1445_v27, %v1444_v25  ;;  %v1546_v3 = vpack.i.b16 %v3304_v1, %v3302_v28 }
 0x2a1   : > { %v3235_v8 = vrot.slane %v1702_v4, %v3007_v57  ;;  %v3240_v10 = vrot.slane %v1703_v5, %v3007_v57  ;;  %1082 = vst.msk [vmem:[#allocation3 + $0x98] sm:$0xff] %vm777_vm1, %v1073_v12  ;;  %v3273_v39 = vrot.slane %v1686_v26, %v3007_v57  ;;  %v1476_v5 = vshrl.u32 %v3190_v33, 16 }
 0x2a2   : > { %v1176_v16 = vpop.permute.xlu1 %1175  ;;  %v3350_v35 = vld [vmem:[#allocation3 + $0x80] sm:$0xff]  ;;  %v1727_v55 = vcombine.high %v3336_v36, %v3326_v45  ;;  %v3369_v58 = vrot.slane %v1743_v11, %v2992_v42 }
 0x2a3   : > { %3785 = vst [vmem:[#allocation5_spill] sm:$0xff] %v3235_v8  ;;  %v1723_v60 = vcombine.high %v3232_v7, %v3235_v8  ;;  %v1724_v17 = vcombine.low %v3245_v13, %v3240_v10  ;;  %1188 = vst.msk [vmem:[#allocation3 + $0xa0] sm:$0xff] %vm777_vm1, %v1176_v16  ;;  %v3356_v43 = vpack.i.b16 %v1477_v6, %v1476_v5  ;;  %v3792_v7 = vmov 0  }
 0x2a4   : > { %v1178_v20 = vpop.permute.xlu0 %1177  ;;  %3786 = vst [vmem:[#allocation6_spill] sm:$0xff] %v3273_v39 }
 0x2a5   : > { %2341 = vrot.lane.b32.xlu1 %v1723_v60, %s2854_s16  ;;  %1189 = vst.msk [vmem:[#allocation3 + $0xa8] sm:$0xff] %vm777_vm1, %v1178_v20  ;;  %v3324_v60 = vld [vmem:[#allocation3 + $0xf8] sm:$0xff] }
 0x2a6   : > { %v1180_v30 = vpop.permute.xlu1 %1179  ;;  %v3320_v54 = vld [vmem:[#allocation3 + $0x90] sm:$0xff]  ;;  %v1562_v52 = vpack.i.b16 %v3324_v60, %v3316_v37 }
 0x2a7   : > { %1190 = vst.msk [vmem:[#allocation3 + $0xb0] sm:$0xff] %vm777_vm1, %v1180_v30  ;;  %v3346_v30 = vpack.i.b16 %v1493_v50, %v1492_v62  ;;  %v1554_v62 = vpack.i.b16 %v3354_v41, %v3338_v15 }
 0x2a8   : > { %v1182_v34 = vpop.permute.xlu0 %1181  ;;  %v3322_v9 = vld [vmem:[#allocation3 + $0x98] sm:$0xff]  ;;  %v1910_v22 = vcombine.low %v1546_v3, %v1562_v52 }
 0x2a9   : > { %2359 = vrot.lane.b32.xlu1 %v1724_v17, %s2852_s14  ;;  %1191 = vst.msk [vmem:[#allocation3 + $0xb8] sm:$0xff] %vm777_vm1, %v1182_v34  ;;  %v1538_v17 = vpack.i.b16 %v3300_v63, %v3294_v61  ;;  %v3348_v34 = vpack.i.b16 %v1501_v31, %v1500_v2 }
 0x2aa   : > { %v1388_v40 = vpop.permute.xlu1 %1387  ;;  %v3332_v12 = vld [vmem:[#allocation3 + $0xa0] sm:$0xff]  ;;  %v3430_v8 = vrot.slane %v1910_v22, %v2992_v42 }
 0x2ab   : > { %1400 = vst.msk [vmem:[#allocation3 + $0x100] sm:$0xff] %vm777_vm1, %v1388_v40  ;;  %v3352_v40 = vld [vmem:[#allocation3 + $0x88] sm:$0xff]  ;;  %v1775_v59 = vcombine.high %v3328_v46, %v3348_v34 }
 0x2ac   : > { %v1390_v44 = vpop.permute.xlu0 %1389  ;;  %v3334_v14 = vld [vmem:[#allocation3 + $0xa8] sm:$0xff]  ;;  %v1506_v27 = vpack.i.b16 %v3352_v40, %v3350_v35 }
 0x2ad   : > { %1401 = vst.msk [vmem:[#allocation3 + $0x108] sm:$0xff] %vm777_vm1, %v1390_v44  ;;  %v1514_v44 = vpack.i.b16 %v3322_v9, %v3320_v54  ;;  %v1522_v51 = vpack.i.b16 %v3334_v14, %v3332_v12 }
 0x2ae   : > { %v1392_v29 = vpop.permute.xlu1 %1391  ;;  %v3312_v4 = vld [vmem:[#allocation3 + $0xb0] sm:$0xff] }
 0x2af   : > { %1402 = vst.msk [vmem:[#allocation3 + $0x110] sm:$0xff] %vm777_vm1, %v1392_v29  ;;  %v1863_v11 = vcombine.high %v1506_v27, %v1522_v51 }
 0x2b0   : > { %v1394_v24 = vpop.permute.xlu0 %1393  ;;  %v3314_v32 = vld [vmem:[#allocation3 + $0xb8] sm:$0xff] }
 0x2b1   : > { %1403 = vst.msk [vmem:[#allocation3 + $0x118] sm:$0xff] %vm777_vm1, %v1394_v24  ;;  %v1530_v16 = vpack.i.b16 %v3314_v32, %v3312_v4 }
 0x2b2   : > { %v1436_v38 = vld [vmem:[#allocation3 + $0x100] sm:$0xff] }
 0x2b3   : > { %v1572_v20 = vshrl.u32 %v1436_v38, 16  ;;  %v1879_v50 = vcombine.high %v1514_v44, %v1530_v16  ;;  %v1878_v6 = vcombine.low %v1514_v44, %v1530_v16  ;;  %v1895_v44 = vcombine.high %v1538_v17, %v1554_v62 }
 0x2b4   : > { %v1437_v33 = vld [vmem:[#allocation3 + $0x108] sm:$0xff] }
 0x2b5   : > { %v1573_v26 = vshrl.u32 %v1437_v33, 16  ;;  %v3364_v29 = vpack.i.b16 %v1437_v33, %v1436_v38  ;;  %v1759_v38 = vcombine.high %v3356_v43, %v3346_v30  ;;  %v1911_v33 = vcombine.high %v1546_v3, %v1562_v52 }
 0x2b6   : > { %v1438_v53 = vld [vmem:[#allocation3 + $0x110] sm:$0xff]  ;;  %v3397_v16 = vrot.slane %v1879_v50, %v2992_v42 }
 0x2b7   : > { %v1580_v25 = vshrl.u32 %v1438_v53, 16  ;;  %v3379_v31 = vpack.i.b16 %v1573_v26, %v1572_v20  ;;  %v3385_v49 = vrot.slane %v3364_v29, %v2992_v42  ;;  %v1862_v20 = vcombine.low %v1506_v27, %v1522_v51 }
 0x2b8   : > { %v1439_v24 = vld [vmem:[#allocation3 + $0x118] sm:$0xff]  ;;  %v3394_v26 = vrot.slane %v1775_v59, %v2992_v42  ;;  %v3410_v51 = vrot.slane %v1878_v6, %v2992_v42  ;;  %v1687_v59 = vcombine.high %v3260_v19, %v3252_v18  ;;  %v3415_v27 = vrot.slane %v1759_v38, %v2992_v42 }
 0x2b9   : > { %v3377_v2 = vpack.i.b16 %v1439_v24, %v1438_v53  ;;  %3788 = vst [vmem:[#allocation8_spill] sm:$0xff] %v3379_v31  ;;  %v1581_v5 = vshrl.u32 %v1439_v24, 16  ;;  %v1894_v24 = vcombine.low %v1538_v17, %v1554_v62  ;;  %v3403_v52 = vrot.slane %v3379_v31, %v2992_v42 }
 0x2ba   : > { %v3418_v17 = vrot.slane %v1863_v11, %v2992_v42  ;;  %v3421_v62 = vrot.slane %v1911_v33, %v2992_v42  ;;  %v3427_v6 = vrot.slane %v1862_v20, %v2992_v42  ;;  %v1655_v18 = vcombine.high %v3264_v23, %v3257_v21 }
 0x2bb   : > { %v3389_v0 = vrot.slane %v3377_v2, %v2992_v42  ;;  %v3391_v53 = vpack.i.b16 %v1581_v5, %v1580_v25  ;;  %v3435_v19 = vrot.slane %v1727_v55, %v2992_v42  ;;  %v3438_v38 = vrot.slane %v1895_v44, %v2992_v42 }
 0x2bc   : > { %v1942_v11 = vcombine.low %v3418_v17, %v3397_v16  ;;  %v1838_v22 = vcombine.low %v3415_v27, %v3394_v26  ;;  %v3449_v20 = vrot.slane %v1894_v24, %v2992_v42  ;;  %v1926_v21 = vcombine.low %v3427_v6, %v3410_v51 }
 0x2bd   : > { %3789 = vst [vmem:[#allocation9_spill] sm:$0xff] %v3391_v53  ;;  %v2165_v3 = vcombine.high %v3385_v49, %v3389_v0  ;;  %v3407_v25 = vrot.slane %v3391_v53, %v2992_v42  ;;  %3790 = vst [vmem:[#allocation10_spill] sm:$0xff] %v3435_v19  ;;  %v1974_v23 = vcombine.low %v3438_v38, %v3421_v62 }
 0x2be   : > { %v1719_v55 = vcombine.high %v3279_v48, %v3273_v39  ;;  %v1701_v44 = vrot.slane %v1687_v59, %v3007_v57  ;;  %v1958_v24 = vcombine.low %v3449_v20, %v3430_v8  ;;  %v1846_v53 = vrot.slane %v1838_v22, %v3007_v57 }
 0x2bf   : > { %v2179_v50 = vrot.slane %v2165_v3, %v3007_v57  ;;  %v2231_v5 = vcombine.high %v3403_v52, %v3407_v25  ;;  %v1806_v3 = vcombine.low %v3435_v19, %v3369_v58  ;;  %v3472_v39 = vrot.slane %v1926_v21, %v3007_v57 }
 0x2c0   : > { %v3475_v59 = vrot.slane %v1974_v23, %v3007_v57  ;;  %v3480_v19 = vrot.slane %v1958_v24, %v3007_v57  ;;  %v1726_v21 = vcombine.low %v3336_v36, %v3326_v45  ;;  %v1758_v23 = vcombine.low %v3356_v43, %v3346_v30 }
 0x2c1   : > { %2300 = vrot.lane.b32.xlu0 %v2179_v50, %s2852_s14  ;;  %v3444_v33 = vrot.slane %v2231_v5, %v3007_v57  ;;  %v3465_v5 = vrot.slane %v1942_v11, %v3007_v57  ;;  %v2197_v31 = vcombine.high %v2179_v50, %v3792_v7  ;;  %v1814_v11 = vrot.slane %v1806_v3, %v3007_v57 }
 0x2c2   : > { %v1990_v22 = vcombine.low %v3472_v39, %v3480_v19  ;;  %v1540_v3 = vshrl.u32 %v3294_v61, 16  ;;  %v1541_v24 = vshrl.u32 %v3300_v63, 16  ;;  %v3508_v36 = vrot.slane %v1726_v21, %v2992_v42 }
 0x2c3   : > { %3791 = vst [vmem:[#allocation11_spill] sm:$0xff] %v3444_v33  ;;  %2309 = vrot.lane.b32.xlu1 %v3444_v33, %s2851_s13  ;;  %v1669_v33 = vrot.slane %v1655_v18, %v3007_v57  ;;  %v1994_v50 = vcombine.low %v3465_v5, %v3475_v59  ;;  %v1858_v18 = vcombine.low %v1814_v11, %v1846_v53  ;;  %v1508_v43 = vshrl.u32 %v3350_v35, 16 }
 0x2c4   : > { %v1859_v45 = vcombine.high %v1814_v11, %v1846_v53  ;;  %v1532_v53 = vshrl.u32 %v3312_v4, 16  ;;  %v1533_v11 = vshrl.u32 %v3314_v32, 16  ;;  %v1517_v35 = vshrl.u32 %v3322_v9, 16 }
 0x2c5   : > { %2278 = vrot.lane.b32.xlu0 %v1719_v55, %s2854_s16  ;;  %v1720_v48 = vcombine.low %v1669_v33, %v1701_v44  ;;  %v1774_v55 = vcombine.low %v3328_v46, %v3348_v34  ;;  %v1549_v46 = vshrl.u32 %v3304_v1, 16  ;;  %v1721_v63 = vcombine.high %v1669_v33, %v1701_v44 }
 0x2c6   : > { %v2164_v1 = vcombine.low %v3385_v49, %v3389_v0  ;;  %v1975_v34 = vcombine.high %v3438_v38, %v3421_v62  ;;  %v1943_v0 = vcombine.high %v3418_v17, %v3397_v16  ;;  %v1524_v4 = vshrl.u32 %v3332_v12, 16 }
 0x2c7   : > { %2318 = vrot.lane.b32.xlu1 %v2197_v31, %s2849_s11  ;;  %v1742_v31 = vcombine.low %v3307_v47, %v3290_v56  ;;  %v3503_v56 = vpack.i.b16 %v3792_v7, %v3792_v7  ;;  %v1548_v47 = vshrl.u32 %v3302_v28, 16  ;;  %v3517_v61 = vrot.slane %v1774_v55, %v2992_v42 }
 0x2c8   : > { %v2230_v28 = vcombine.low %v3403_v52, %v3407_v25  ;;  %v1995_v52 = vcombine.high %v3465_v5, %v3475_v59  ;;  %v1516_v25 = vshrl.u32 %v3320_v54, 16  ;;  %v1565_v32 = vshrl.u32 %v3324_v60, 16 }
 0x2c9   : > { %2296 = vrot.lane.b32.xlu0 %v1720_v48, %s2852_s14  ;;  %v1725_v48 = vcombine.high %v3245_v13, %v3240_v10  ;;  %v3511_v10 = vrot.slane %v1742_v31, %v2992_v42  ;;  %v3514_v13 = vrot.slane %v1758_v23, %v2992_v42  ;;  %v2149_v30 = vcombine.high %v3377_v2, %v3503_v56 }
 0x2ca   : > { %v2134_v49 = vcombine.high %v3364_v29, %v3503_v56  ;;  %v1564_v2 = vshrl.u32 %v3316_v37, 16  ;;  %v3545_v62 = vrot.slane %v2230_v28, %v3007_v57  ;;  %v3548_v16 = vrot.slane %v2164_v1, %v3007_v57 }
 0x2cb   : > { %2332 = vrot.lane.b32.xlu1 %v1858_v18, %s2855_s17  ;;  %v3551_v29 = vrot.slane %v2149_v30, %v2992_v42  ;;  %v1525_v37 = vshrl.u32 %v3334_v14, 16  ;;  %v1509_v54 = vshrl.u32 %v3352_v40, 16  ;;  %v1534_v9 = vpack.i.b16 %v1533_v11, %v1532_v53 }
 0x2cc   : > { %v1556_v12 = vshrl.u32 %v3338_v15, 16  ;;  %v1557_v60 = vshrl.u32 %v3354_v41, 16  ;;  %v1991_v17 = vcombine.high %v3472_v39, %v3480_v19  ;;  %v1957_v38 = vrot.slane %v1943_v0, %v3007_v57 }
 0x2cd   : > { %2377 = vrot.lane.b32.xlu0 %v1725_v48, %s2849_s11  ;;  %v3563_v33 = vrot.slane %v2134_v49, %v2992_v42  ;;  %v1927_v14 = vcombine.high %v3427_v6, %v3410_v51  ;;  %v1989_v40 = vrot.slane %v1975_v34, %v3007_v57  ;;  %v1959_v15 = vcombine.high %v3449_v20, %v3430_v8 }
 0x2ce   : > { %v1822_v41 = vcombine.low %v3514_v13, %v3517_v61  ;;  %v1566_v44 = vpack.i.b16 %v1565_v32, %v1564_v2  ;;  %v2196_v18 = vcombine.high %v3548_v16, %v3792_v7  ;;  %v1518_v31 = vpack.i.b16 %v1517_v35, %v1516_v25  ;;  %v3793_v35 = vld [vmem:[#allocation10_spill] sm:$0xff] }
 0x2cf   : > { %2350 = vrot.lane.b32.xlu1 %v1859_v45, %s2853_s15  ;;  %v2181_v21 = vcombine.high %v3563_v33, %v3551_v29  ;;  %v1526_v23 = vpack.i.b16 %v1525_v37, %v1524_v4  ;;  %v1790_v51 = vcombine.low %v3508_v36, %v3511_v10  ;;  %v1550_v6 = vpack.i.b16 %v1549_v46, %v1548_v47 }
 0x2d0   : > { %v1558_v55 = vpack.i.b16 %v1557_v60, %v1556_v12  ;;  %v1996_v8 = vcombine.low %v1957_v38, %v1989_v40  ;;  %v1941_v20 = vrot.slane %v1927_v14, %v3007_v57  ;;  %v1510_v48 = vpack.i.b16 %v1509_v54, %v1508_v43 }
 0x2d1   : > { %2314 = vrot.lane.b32.xlu0 %v1721_v63, %s2849_s11  ;;  %v2015_v45 = vcombine.high %v1518_v31, %v1534_v9  ;;  %v1830_v63 = vrot.slane %v1822_v41, %v3007_v57  ;;  %v1542_v28 = vpack.i.b16 %v1541_v24, %v1540_v3  ;;  %v3584_v1 = vrot.slane %v2181_v21, %v3007_v57 }
 0x2d2   : > { %v1973_v30 = vrot.slane %v1959_v15, %v3007_v57  ;;  %v1999_v34 = vcombine.high %v1510_v48, %v1526_v23  ;;  %v2047_v47 = vcombine.high %v1550_v6, %v1566_v44  ;;  %v1798_v46 = vrot.slane %v1790_v51, %v3007_v57 }
 0x2d3   : > { %2343 = vrot.lane.b32.xlu1 %v1995_v52, %s2854_s16  ;;  %v2031_v53 = vcombine.high %v1542_v28, %v1558_v55  ;;  %v2029_v11 = vrot.slane %v2015_v45, %v2992_v42  ;;  %v2014_v52 = vcombine.low %v1518_v31, %v1534_v9  ;;  %v1839_v24 = vcombine.high %v3415_v27, %v3394_v26 }
 0x2d4   : > { %v1992_v43 = vcombine.low %v1941_v20, %v1973_v30  ;;  %v1854_v3 = vcombine.low %v1798_v46, %v1830_v63  ;;  %v2013_v0 = vrot.slane %v1999_v34, %v2992_v42  ;;  %v2061_v49 = vrot.slane %v2047_v47, %v2992_v42 }
 0x2d5   : > { %2273 = vrot.lane.b32.xlu0 %v3545_v62, %s2855_s17  ;;  %v1998_v2 = vcombine.low %v1510_v48, %v1526_v23  ;;  %v2046_v25 = vcombine.low %v1550_v6, %v1566_v44  ;;  %v1807_v4 = vcombine.high %v3793_v35, %v3369_v58  ;;  %v2045_v32 = vrot.slane %v2031_v53, %v2992_v42  ;;  %v3795_v48 = vld [vmem:[#allocation8_spill] sm:$0xff] }
 0x2d6   : > { %v1997_v37 = vcombine.high %v1957_v38, %v1989_v40  ;;  %v2078_v54 = vcombine.low %v2013_v0, %v2029_v11  ;;  %v2022_v9 = vrot.slane %v2014_v52, %v2992_v42  ;;  %v2030_v26 = vcombine.low %v1542_v28, %v1558_v55  ;;  %v3794_v55 = vld [vmem:[#allocation9_spill] sm:$0xff] }
 0x2d7   : > { %2280 = vrot.lane.b32.xlu1 %v1991_v17, %s2854_s16  ;;  %v1855_v27 = vcombine.high %v1798_v46, %v1830_v63  ;;  %v1853_v12 = vrot.slane %v1839_v24, %v3007_v57  ;;  %v2110_v60 = vcombine.low %v2045_v32, %v2061_v49  ;;  %v1823_v17 = vcombine.high %v3514_v13, %v3517_v61 }
 0x2d8   : > { %v2006_v58 = vrot.slane %v1998_v2, %v2992_v42  ;;  %v2054_v14 = vrot.slane %v2046_v25, %v2992_v42  ;;  %v1821_v15 = vrot.slane %v1807_v4, %v3007_v57  ;;  %v1791_v38 = vcombine.high %v3508_v36, %v3511_v10 }
 0x2d9   : > { %2282 = vrot.lane.b32.xlu0 %v2196_v18, %s2854_s16  ;;  %v1993_v40 = vcombine.high %v1941_v20, %v1973_v30  ;;  %v2086_v41 = vrot.slane %v2078_v54, %v3007_v57  ;;  %v2038_v44 = vrot.slane %v2030_v26, %v2992_v42  ;;  %v2118_v61 = vrot.slane %v2110_v60, %v3007_v57  ;;  %v2554_v60 = vld [vmem:[%s3766_s6] sm:$0xff] }
 0x2da   : > { %v2062_v18 = vcombine.low %v2006_v58, %v2022_v9  ;;  %v1860_v13 = vcombine.low %v1821_v15, %v1853_v12  ;;  %v1837_v21 = vrot.slane %v1823_v17, %v3007_v57  ;;  %v1805_v36 = vrot.slane %v1791_v38, %v3007_v57 }
 0x2db   : > { %2361 = vrot.lane.b32.xlu1 %v1996_v8, %s2852_s14  ;;  %v2094_v31 = vcombine.low %v2038_v44, %v2054_v14  ;;  %v2130_v23 = vcombine.low %v2086_v41, %v2118_v61  ;;  %v2215_v8 = vcombine.high %v3794_v55, %v3503_v56  ;;  %v2200_v45 = vcombine.high %v3795_v48, %v3503_v56  ;;  %v3798_v48 = vld [vmem:[#allocation5_spill] sm:$0xff] }
 0x2dc   : > { %v2070_v10 = vrot.slane %v2062_v18, %v3007_v57  ;;  %v1856_v51 = vcombine.low %v1805_v36, %v1837_v21  ;;  %v1861_v63 = vcombine.high %v1821_v15, %v1853_v12  ;;  %v2131_v30 = vcombine.high %v2086_v41, %v2118_v61 }
 0x2dd   : > { %2363 = vrot.lane.b32.xlu0 %v3584_v1, %s2852_s14  ;;  %v2102_v6 = vrot.slane %v2094_v31, %v3007_v57  ;;  %v2229_v28 = vrot.slane %v2215_v8, %v2992_v42  ;;  %v2214_v34 = vrot.slane %v2200_v45, %v2992_v42  ;;  %v2079_v47 = vcombine.high %v2013_v0, %v2029_v11 }
 0x2de   : > { %v1857_v46 = vcombine.high %v1805_v36, %v1837_v21  ;;  %v2180_v52 = vcombine.low %v3563_v33, %v3551_v29  ;;  %v2063_v24 = vcombine.high %v2006_v58, %v2022_v9  ;;  %v2095_v0 = vcombine.high %v2038_v44, %v2054_v14 }
 0x2df   : > { %2298 = vrot.lane.b32.xlu1 %v1992_v43, %s2852_s14  ;;  %v2126_v20 = vcombine.low %v2070_v10, %v2102_v6  ;;  %v2246_v53 = vcombine.low %v2214_v34, %v2229_v28  ;;  %v2111_v43 = vcombine.high %v2045_v32, %v2061_v49  ;;  %v2127_v56 = vcombine.high %v2070_v10, %v2102_v6 }
 0x2e0   : > { %v3639_v11 = vrot.slane %v2180_v52, %v3007_v57  ;;  %v2077_v29 = vrot.slane %v2063_v24, %v3007_v57  ;;  %v2109_v25 = vrot.slane %v2095_v0, %v3007_v57  ;;  %v2262_v4 = vcombine.high %v3545_v62, %v3792_v7  ;;  %v3796_v62 = vld [vmem:[#allocation11_spill] sm:$0xff] }
 0x2e1   : > { %2269 = vrot.lane.b32.xlu0 %v1854_v3, %s2855_s17  ;;  %v2093_v3 = vrot.slane %v2079_v47, %v3007_v57  ;;  %v2254_v2 = vrot.slane %v2246_v53, %v3007_v57  ;;  %v2125_v42 = vrot.slane %v2111_v43, %v3007_v57  ;;  %v2247_v32 = vcombine.high %v2214_v34, %v2229_v28  ;;  %v3801_v53 = vld [vmem:[#allocation6_spill] sm:$0xff] }
 0x2e2   : > { %v2198_v33 = vcombine.high %v3639_v11, %v3792_v7  ;;  %v2128_v35 = vcombine.low %v2077_v29, %v2109_v25  ;;  %v2129_v9 = vcombine.high %v2077_v29, %v2109_v25  ;;  %v2199_v26 = vcombine.high %v3584_v1, %v3792_v7  ;;  %v2493_v1 = vld [vmem:[%s3764_s4] sm:$0xf] }
 0x2e3   : > { %2379 = vrot.lane.b32.xlu1 %v1997_v37, %s2849_s11  ;;  %v2132_v49 = vcombine.low %v2093_v3, %v2125_v42  ;;  %v2133_v37 = vcombine.high %v2093_v3, %v2125_v42  ;;  %v2261_v54 = vrot.slane %v2247_v32, %v3007_v57  ;;  %v2264_v12 = vcombine.high %v2254_v2, %v3792_v7 }
 0x2e5   : > { %2287 = vrot.lane.b32.xlu0 %v1855_v27, %s2853_s15  ;;  %v2263_v27 = vcombine.high %v3796_v62, %v3792_v7  ;;  %v2265_v57 = vcombine.high %v2261_v54, %v3792_v7 }
 0x2e7   : > { %2316 = vrot.lane.b32.xlu1 %v1993_v40, %s2849_s11 }
 0x2e9   : > { %2368 = vrot.lane.b32.xlu0 %v1860_v13, %s2851_s13 }
 0x2eb   : > { %2334 = vrot.lane.b32.xlu1 %v2130_v23, %s2855_s17 }
 0x2ed   : > { %2305 = vrot.lane.b32.xlu0 %v1856_v51, %s2851_s13 }
 0x2ef   : > { %2271 = vrot.lane.b32.xlu1 %v2126_v20, %s2855_s17  ;;  %v3797_v20 = vld [vmem:[#allocation4_spill] sm:$0xff] }
 0x2f0   : > { %v3799_v45 = vcombine.low %v3797_v20, %v3798_v48 }
 0x2f1   : > { %2386 = vrot.lane.b32.xlu0 %v1861_v63, %s2850_s12 }
 0x2f3   : > { %2352 = vrot.lane.b32.xlu1 %v2131_v30, %s2853_s15 }
 0x2f5   : > { %2323 = vrot.lane.b32.xlu0 %v1857_v46, %s2850_s12  ;;  %v3800_v46 = vld [vmem:[#allocation7_spill] sm:$0xff] }
 0x2f6   : > { %v3802_v43 = vcombine.low %v3800_v46, %v3801_v53 }
 0x2f7   : > { %2289 = vrot.lane.b32.xlu1 %v2127_v56, %s2853_s15 }
 0x2f9   : > { %2336 = vrot.lane.b32.xlu0 %v2254_v2, %s2855_s17 }
 0x2fb   : > { %2370 = vrot.lane.b32.xlu1 %v2132_v49, %s2851_s13 }
 0x2fd   : > { %2345 = vrot.lane.b32.xlu0 %v2198_v33, %s2854_s16 }
 0x2ff   : > { %2307 = vrot.lane.b32.xlu1 %v2128_v35, %s2851_s13 }
 0x301   : > { %2291 = vrot.lane.b32.xlu0 %v2262_v4, %s2853_s15 }
 0x303   : > { %2388 = vrot.lane.b32.xlu1 %v2133_v37, %s2850_s12 }
 0x305   : > { %2372 = vrot.lane.b32.xlu0 %v2261_v54, %s2851_s13 }
 0x307   : > { %2325 = vrot.lane.b32.xlu1 %v2129_v9, %s2850_s12 }
 0x309   : > { %2381 = vrot.lane.b32.xlu0 %v2199_v26, %s2849_s11 }
 0x30b   : > { %2327 = vrot.lane.b32.xlu1 %v2263_v27, %s2850_s12 }
 0x30d   : > { %2354 = vrot.lane.b32.xlu0 %v2264_v12, %s2853_s15 }
 0x30f   : > { %2496 = vperm.xlu1 %2791, %v2493_v1  }
 0x311   : > { %2390 = vrot.lane.b32.xlu0 %v2265_v57, %s2850_s12  ;;  %s278_s12 = scalar_lea.vmem %s3767_s7, %s2759_s28 }
 0x315   : > { %2557 = vperm.xlu0 %2790, %v2554_v60  }
 0x317   : > { %v2342_v17 = vpop.permute.xlu1 %2341 }
 0x31b   : > { %v2360_v58 = vpop.permute.xlu1 %2359 }
 0x333   : > { %v3672_v14 = vpop.permute.xlu0 %2300 }
 0x335   : > { %v3674_v15 = vpop.permute.xlu1 %2309 }
 0x337   : > { %v2279_v38 = vpop.permute.xlu0 %2278 }
 0x339   : > { %v3676_v7 = vpop.permute.xlu1 %2318 }
 0x33b   : > { %v2297_v40 = vpop.permute.xlu0 %2296 }
 0x33d   : > { %v2333_v41 = vpop.permute.xlu1 %2332 }
 0x33e   : > { %v2447_v63 = vsel %vm777_vm1, %v3799_v45, %v2333_v41 }
 0x33f   : > { %v2378_v44 = vpop.permute.xlu0 %2377  ;;  %v2455_v30 = vsel %vm2401_vm4, %v2447_v63, %v2342_v17 }
 0x341   : > { %v2351_v18 = vpop.permute.xlu1 %2350 }
 0x342   : > { %v2461_v47 = vsel %vm2408_vm5, %v2455_v30, %v2351_v18 }
 0x343   : > { %v2315_v13 = vpop.permute.xlu0 %2314  ;;  %v2467_v24 = vsel %vm2415_vm6, %v2461_v47, %v2360_v58  ;;  %v2492_v47 = vld [vmem:[%s3763_s3] sm:$0x3] }
 0x345   : > { %v2344_v61 = vpop.permute.xlu1 %2343 }
 0x347   : > { %v2274_v21 = vpop.permute.xlu0 %2273 }
 0x348   : > { %v2400_v5 = vsel %vm777_vm1, %v3548_v16, %v2274_v21 }
 0x349   : > { %v2281_v31 = vpop.permute.xlu1 %2280 }
 0x34b   : > { %v2283_v23 = vpop.permute.xlu0 %2282 }
 0x34c   : > { %v2407_v41 = vsel %vm2401_vm4, %v2400_v5, %v2283_v23 }
 0x34d   : > { %v2362_v36 = vpop.permute.xlu1 %2361 }
 0x34f   : > { %v3678_v10 = vpop.permute.xlu0 %2363 }
 0x351   : > { %v2299_v51 = vpop.permute.xlu1 %2298 }
 0x353   : > { %v2270_v6 = vpop.permute.xlu0 %2269 }
 0x354   : > { %v2394_v52 = vsel %vm777_vm1, %v3802_v43, %v2270_v6 }
 0x355   : > { %v2380_v55 = vpop.permute.xlu1 %2379  ;;  %v2403_v3 = vsel %vm2401_vm4, %v2394_v52, %v2279_v38 }
 0x357   : > { %v2288_v8 = vpop.permute.xlu0 %2287 }
 0x358   : > { %v2410_v42 = vsel %vm2408_vm5, %v2403_v3, %v2288_v8 }
 0x359   : > { %v2317_v28 = vpop.permute.xlu1 %2316  ;;  %v2417_v29 = vsel %vm2415_vm6, %v2410_v42, %v2297_v40 }
 0x35b   : > { %v2369_v34 = vpop.permute.xlu0 %2368 }
 0x35c   : > { %v2473_v0 = vsel %vm2422_vm7, %v2467_v24, %v2369_v34 }
 0x35d   : > { %v2335_v56 = vpop.permute.xlu1 %2334  ;;  %v2479_v25 = vsel %vm2429_vm8, %v2473_v0, %v2378_v44 }
 0x35e   : > { %v2450_v62 = vsel %vm777_vm1, %v1994_v50, %v2335_v56 }
 0x35f   : > { %v2306_v2 = vpop.permute.xlu0 %2305  ;;  %v2457_v12 = vsel %vm2401_vm4, %v2450_v62, %v2344_v61 }
 0x360   : > { %v2424_v35 = vsel %vm2422_vm7, %v2417_v29, %v2306_v2  ;;  %v2551_v29 = vld [vmem:[%s3765_s5] sm:$0xf] }
 0x361   : > { %v2272_v49 = vpop.permute.xlu1 %2271  ;;  %v2431_v54 = vsel %vm2429_vm8, %v2424_v35, %v2315_v13  ;;  %v2611_v35 = vld [vmem:[%s2924_s8] sm:$0xff] }
 0x362   : > { %v2397_v60 = vsel %vm777_vm1, %v1990_v22, %v2272_v49 }
 0x363   : > { %v2387_v33 = vpop.permute.xlu0 %2386  ;;  %v2405_v58 = vsel %vm2401_vm4, %v2397_v60, %v2281_v31 }
 0x364   : > { %v2485_v4 = vsel %vm2436_vm9, %v2479_v25, %v2387_v33 }
 0x365   : > { %v2353_v32 = vpop.permute.xlu1 %2352  ;;  %2508 = vmatprep.subr.bf16.mxu1 %v2485_v4 }
 0x366   : > { %v2463_v1 = vsel %vm2408_vm5, %v2457_v12, %v2353_v32 }
 0x367   : > { %v2324_v37 = vpop.permute.xlu0 %2323  ;;  %v2469_v38 = vsel %vm2415_vm6, %v2463_v1, %v2362_v36 }
 0x368   : > { %v2438_v9 = vsel %vm2436_vm9, %v2431_v54, %v2324_v37  ;;  %v2612_v37 = vld [vmem:[%s2924_s8 + $0x8] sm:$0xff] }
 0x369   : > { %v2290_v26 = vpop.permute.xlu1 %2289  ;;  %2509 = vmatpush1.bf16.msra.mxu1 %v2438_v9 }
 0x36a   : > { %v2412_v59 = vsel %vm2408_vm5, %v2405_v58, %v2290_v26 }
 0x36b   : > { %v2337_v27 = vpop.permute.xlu0 %2336  ;;  %v2419_v22 = vsel %vm2415_vm6, %v2412_v59, %v2299_v51 }
 0x36d   : > { %v2371_v57 = vpop.permute.xlu1 %2370 }
 0x36e   : > { %v2475_v50 = vsel %vm2422_vm7, %v2469_v38, %v2371_v57 }
 0x36f   : > { %v2346_v17 = vpop.permute.xlu0 %2345  ;;  %v2481_v13 = vsel %vm2429_vm8, %v2475_v50, %v2380_v55  ;;  %v2453_v55 = vsel %vm777_vm1, %v3639_v11, %v2337_v27 }
 0x370   : > { %v2459_v8 = vsel %vm2401_vm4, %v2453_v55, %v2346_v17 }
 0x371   : > { %v2308_v40 = vpop.permute.xlu1 %2307 }
 0x372   : > { %v2426_v61 = vsel %vm2422_vm7, %v2419_v22, %v2308_v40 }
 0x373   : > { %v2292_v39 = vpop.permute.xlu0 %2291  ;;  %v2433_v51 = vsel %vm2429_vm8, %v2426_v61, %v2317_v28 }
 0x374   : > { %v2414_v19 = vsel %vm2408_vm5, %v2407_v41, %v2292_v39 }
 0x375   : > { %v2421_v44 = vsel %vm2415_vm6, %v2414_v19, %v3672_v14  ;;  %v2389_v18 = vpop.permute.xlu1 %2388 }
 0x376   : > { %v2488_v16 = vsel %vm2436_vm9, %v2481_v13, %v2389_v18  ;;  %v2428_v21 = vsel %vm2422_vm7, %v2421_v44, %v3674_v15 }
 0x377   : > { %2510 = vmatprep.subr.bf16.mxu1 %v2488_v16  ;;  %v2373_v31 = vpop.permute.xlu0 %2372  ;;  %v2435_v23 = vsel %vm2429_vm8, %v2428_v21, %v3676_v7 }
 0x379   : > { %v2326_v36 = vpop.permute.xlu1 %2325 }
 0x37a   : > { %v2441_v14 = vsel %vm2436_vm9, %v2433_v51, %v2326_v36 }
 0x37b   : > { %2511 = vmatpush1.bf16.msra.mxu1 %v2441_v14  ;;  %v2382_v6 = vpop.permute.xlu0 %2381 }
 0x37d   : > { %v2328_v20 = vpop.permute.xlu1 %2327 }
 0x37e   : > { %v2444_v7 = vsel %vm2436_vm9, %v2435_v23, %v2328_v20 }
 0x37f   : > { %v2355_v48 = vpop.permute.xlu0 %2354  ;;  %v2504_v11 = vsel %vm2503_vm10, %v2444_v7, 0 }
 0x380   : > { %v2465_v15 = vsel %vm2408_vm5, %v2459_v8, %v2355_v48 }
 0x381   : > { %v2471_v45 = vsel %vm2415_vm6, %v2465_v15, %v3678_v10 }
 0x382   : > { %v2477_v63 = vsel %vm2422_vm7, %v2471_v45, %v2373_v31 }
 0x383   : > { %v2483_v28 = vsel %vm2429_vm8, %v2477_v63, %v2382_v6  ;;  %v2391_v30 = vpop.permute.xlu0 %2390 }
 0x384   : > { %v2491_v34 = vsel %vm2436_vm9, %v2483_v28, %v2391_v30 }
 0x385   : > { %2753 = vmatprep.subr.msk.bf16.mxu1 %vm2503_vm10, %v2491_v34 }
 0x386   : > { %2513 = vmatpush1.bf16.msra.mxu1 %v2504_v11 }
 0x389   : > { %2754 = vmatmul.mubr.msk.bf16.vlgmr.msra.gmra.mrb[0].mxu1 %vm2499_vm11, %v2492_v47 }
 0x38e   : > { %v2497_v10 = vpop.permute.xlu1 %2496 }
 0x394   : > { %v2558_v33 = vpop.permute.xlu0 %2557 }
 0x45c   : > { %v2542_v46 = vpop.f32.mrb[0].mxu1 }
 0x45d   : > { %v2543_v53 = vadd.f32 %v2542_v46, %v2497_v10  ;;  %v2544_v43 = vpop.f32.mrb[1].mxu1 }
 0x45e   : > { %v2545_v52 = vadd.f32 %v2544_v43, %v2497_v10  ;;  %v2546_v56 = vpop.f32.mrb[2].mxu1 }
 0x45f   : > { %v2549_v3 = vmax.f32 %v2543_v53, 0.0  ;;  %v2547_v24 = vpop.f32.mrb[3].mxu1 }
 0x460   : > { %v2550_v2 = vmax.f32 %v2545_v52, 0.0 }
 0x461   : > { %v2552_v42 = vpack.c.bf16 %v2549_v3, %v2549_v3 }
 0x462   : > { %v2553_v0 = vpack.c.bf16 %v2550_v2, %v2550_v2 }
 0x463   : > { %v2565_v49 = vsel %vm2503_vm10, %v2552_v42, 0 }
 0x464   : > { %2755 = vmatprep.subr.msk.bf16.mxu0 %vm2503_vm10, %v2553_v0 }
 0x465   : > { %2571 = vmatpush1.bf16.msra.mxu0 %v2565_v49 }
 0x468   : > { %2756 = vmatmul.mubr.msk.bf16.vlgmr.msra.gmra.mrb[4].mxu0 %vm2560_vm12, %v2551_v29 }
 0x53b   : > { %v2604_v25 = vpop.f32.mrb[4].mxu0 }
 0x53c   : > { %v2605_v4 = vadd.f32 %v2604_v25, %v2558_v33  ;;  %v2606_v32 = vpop.f32.mrb[5].mxu0 }
 0x53d   : > { %v2607_v54 = vadd.f32 %v2606_v32, %v2558_v33  ;;  %v2608_v9 = vpop.f32.mrb[6].mxu0 }
 0x53e   : > { %v2613_v26 = vadd.f32 %v2611_v35, %v2605_v4  ;;  %v2609_v62 = vpop.f32.mrb[7].mxu0 }
 0x53f   : > { %v2614_v27 = vadd.f32 %v2612_v37, %v2607_v54 }
 0x540   : > { %v2615_v12 = vmax.f32 %v2613_v26, 0.0 }
 0x541   : > { %v2616_v57 = vmax.f32 %v2614_v27, 0.0 }
 0x542   : > { %2617 = vst [vmem:[%s278_s12] sm:$0xff] %v2615_v12 }
 0x543   : > { %2618 = vst [vmem:[%s278_s12 + $0x8] sm:$0xff] %v2616_v57 }
 0x544 PF: > { %s17_s24 = sadd.s32 1, %s2846_s24  }
 0x545   : > { %p14_p4 = scmp.ge.s32.totalorder %s17_s24, 4  }
 0x547   :  { %16 = sbr.rel (!%p14_p4) target bundleno = 1 (0x1), region = 86 }

</bundles_post_ra>
